<compile_context>
chip_gen: v7x
topology: tpu7x:2x2x1
jax: 0.10.0
libtpu: 0.0.40
codegen_flags: <defaults>
</compile_context>

<pallas_src>
import functools

import jax
import jax.numpy as jnp
from jax.experimental import pallas as pl
from jax.experimental.pallas import tpu as pltpu


def object_encoder_kernel(pre_ref, whh_ref, wconv_ref, bconv_ref, out_ref, *,
                          seq_len, num_objects, rows_per_object, hidden_out):
    """Serial LSTM recurrence (final hidden state) + Conv1d(kernel=O) pooling.

    pre_ref   : (T, P, 4*Ho) f32   hoisted pre-gates, gate order (i, f, o, g)
    whh_ref   : (Ho, 4*Ho)   bf16  LSTM W_hh^T, same gate order
    wconv_ref : (O, Ho, Ho)  bf16  wconv[k, ci, co] = torch_Wconv[co, ci, k]
    bconv_ref : (1, Ho)      f32
    out_ref   : (BP, Ho)     f32   only rows [:B] are meaningful
    """
    T, O, BP, Ho = seq_len, num_objects, rows_per_object, hidden_out
    P = O * BP

    whh_bf = whh_ref[...]                                     # (Ho, 4*Ho) bf16

    # ---- Serial recurrence: one bf16 MXU matmul + elementwise gates per step.
    def step(t, carry):
        h, c = carry
        gates = pre_ref[t] + jnp.dot(h.astype(jnp.bfloat16), whh_bf,
                                     preferred_element_type=jnp.float32)
        # Full-width sigmoid (EUP is pipelined; sigmoid-ing the g block too is
        # free and avoids a 192-lane tile-crossing slice on the critical path).
        sig = jax.nn.sigmoid(gates)                           # (P, 4*Ho)
        g_g = jnp.tanh(gates[:, 3 * Ho:])                     # trailing 64 lanes
        i_g = sig[:, :Ho]
        f_g = sig[:, Ho:2 * Ho]
        o_g = sig[:, 2 * Ho:3 * Ho]
        c_new = f_g * c + i_g * g_g                           # f32 (v5e-safe)
        h_new = o_g * jnp.tanh(c_new)
        return h_new, c_new

    h0 = jnp.zeros((P, Ho), jnp.float32)
    c0 = jnp.zeros((P, Ho), jnp.float32)
    h_fin, _ = jax.lax.fori_loop(0, T, step, (h0, c0), unroll=True)

    # ---- Conv1d(kernel_size=O) pooling: O tile-aligned accumulated matmuls.
    acc = jnp.zeros((BP, Ho), jnp.float32)
    for k in range(O):
        h_k = h_fin[k * BP:(k + 1) * BP, :]                   # 8-sublane aligned
        acc = acc + jnp.dot(h_k.astype(jnp.bfloat16), wconv_ref[k],
                            preferred_element_type=jnp.float32)
    out_ref[...] = acc + bconv_ref[...]


def object_encoder_forward(bbox, kparams):
    """bbox: (B, T, O, D) float32.  Returns (B, output_dim)."""
    B, T, O, D = bbox.shape
    Ho = kparams["w_hh_t"].shape[0]
    BP = ((B + 7) // 8) * 8                 # rows per object, sublane multiple
    P = O * BP

    # Object-major fold with per-object 8-row padding:
    #   x[t, k*BP + b, :] = bbox[b, t, k, :]   (rows b >= B zero-padded)
    x = jnp.transpose(bbox, (1, 2, 0, 3))                       # (T, O, B, D)
    x = jnp.pad(x, ((0, 0), (0, 0), (0, BP - B), (0, 0)))       # (T, O, BP, D)
    x = x.reshape(T * P, D)

    # Hoisted non-recurrent work (XLA): Linear+ReLU and the W_ih projection.
    lin = jnp.maximum(x @ kparams["w_lin_t"] + kparams["b_lin"], 0.0)
    pre = (lin @ kparams["w_ih_t"] + kparams["b_lstm"]).reshape(T, P, 4 * Ho)

    kernel = functools.partial(object_encoder_kernel, seq_len=T, num_objects=O,
                               rows_per_object=BP, hidden_out=Ho)

    # VMEM budget guard (inputs + output + headroom); scales with T*P*Ho.
    vmem_bytes = int(pre.size * 4 + kparams["w_hh_t"].size * 2
                     + kparams["w_conv_k"].size * 2
                     + kparams["b_conv"].size * 4 + BP * Ho * 4)
    vmem_limit = int(min(max(4 * vmem_bytes, 8 << 20), 64 << 20))

    vmem = pltpu.MemorySpace.VMEM
    out = pl.pallas_call(
        kernel,
        out_shape=jax.ShapeDtypeStruct((BP, Ho), jnp.float32),
        in_specs=[pl.BlockSpec(memory_space=vmem)] * 4,
        out_specs=pl.BlockSpec(memory_space=vmem),
        compiler_params=pltpu.CompilerParams(vmem_limit_bytes=vmem_limit),
    )(pre, kparams["w_hh_t"], kparams["w_conv_k"], kparams["b_conv"])
    return out[:B]


def init_torch_params(key, input_dim, hidden_size, output_dim, object_num):
    """Deterministic synthetic parameters in the PyTorch module's layout."""
    ks = jax.random.split(key, 8)

    def u(k, shape, scale):
        return jax.random.uniform(k, shape, jnp.float32, -scale, scale)

    s_lin = 1.0 / float(input_dim) ** 0.5
    s_lstm = 1.0 / float(output_dim) ** 0.5
    s_conv = 1.0 / float(output_dim * object_num) ** 0.5

    return dict(
        w_lin=u(ks[0], (hidden_size, input_dim), s_lin),          # (out, in)
        b_lin=u(ks[1], (hidden_size,), s_lin),
        w_ih=u(ks[2], (4 * output_dim, hidden_size), s_lstm),     # gates i,f,g,o
        w_hh=u(ks[3], (4 * output_dim, output_dim), s_lstm),
        b_ih=u(ks[4], (4 * output_dim,), s_lstm),
        b_hh=u(ks[5], (4 * output_dim,), s_lstm),
        w_conv=u(ks[6], (output_dim, output_dim, object_num), s_conv),  # (Co,Ci,K)
        b_conv=u(ks[7], (output_dim,), s_conv),
    )


def _reorder_gates(w, hidden_out):
    """Torch gate order (i, f, g, o) -> kernel order (i, f, o, g) along axis 0."""
    blocks = [w[k * hidden_out:(k + 1) * hidden_out] for k in (0, 1, 3, 2)]
    return jnp.concatenate(blocks, axis=0)


def prepare_kernel_params(tp, object_num):
    """Convert torch-layout params to the kernel layout.

    MXU-facing weights (W_hh^T, conv weights) are stored bf16; the wrapper-side
    Linear / W_ih projections and all biases stay f32.
    """
    Ho = tp["w_hh"].shape[1]
    w_ih_r = _reorder_gates(tp["w_ih"], Ho)                       # (4Ho, Hh)
    w_hh_r = _reorder_gates(tp["w_hh"], Ho)                       # (4Ho, Ho)
    b_r = _reorder_gates(tp["b_ih"] + tp["b_hh"], Ho)             # (4Ho,)
    return dict(
        w_lin_t=jnp.transpose(tp["w_lin"]),                       # (D, Hh) f32
        b_lin=tp["b_lin"].reshape(1, -1),
        w_ih_t=jnp.transpose(w_ih_r),                             # (Hh, 4Ho) f32
        b_lstm=b_r.reshape(1, -1),
        w_hh_t=jnp.transpose(w_hh_r).astype(jnp.bfloat16),        # (Ho, 4Ho) bf16
        w_conv_k=jnp.transpose(tp["w_conv"], (2, 1, 0)).astype(   # (O, Ho, Ho) bf16
            jnp.bfloat16),
        b_conv=tp["b_conv"].reshape(1, -1),
    )


def reference_forward(bbox, tp):
    """Pure-JAX replica of the PyTorch forward (torch parameter layout)."""
    B, T, O, D = bbox.shape
    Ho = tp["w_hh"].shape[1]
    w_ih_t = tp["w_ih"].T                                         # gate order i,f,g,o
    w_hh_t = tp["w_hh"].T
    b = tp["b_ih"] + tp["b_hh"]
    feats = []
    for k in range(O):
        x = bbox[:, :, k, :]                                      # (B, T, D)
        lin = jnp.maximum(x @ tp["w_lin"].T + tp["b_lin"], 0.0)
        h = jnp.zeros((B, Ho), jnp.float32)
        c = jnp.zeros((B, Ho), jnp.float32)
        for t in range(T):
            gates = lin[:, t, :] @ w_ih_t + h @ w_hh_t + b
            i_g = jax.nn.sigmoid(gates[:, :Ho])
            f_g = jax.nn.sigmoid(gates[:, Ho:2 * Ho])
            g_g = jnp.tanh(gates[:, 2 * Ho:3 * Ho])
            o_g = jax.nn.sigmoid(gates[:, 3 * Ho:])
            c = f_g * c + i_g * g_g
            h = o_g * jnp.tanh(c)
        feats.append(h)                                           # h_n[-1]
    feat = jnp.stack(feats, axis=2)                               # (B, Ho, O)
    out = jnp.einsum("bck,ock->bo", feat, tp["w_conv"]) + tp["b_conv"]
    return out


if __name__ == "__main__":
    # Small shapes consistent with the module's forward:
    # bbox: (batch, seq_len, object_num, input_dim)
    B, T, O = 2, 8, 5
    input_dim, hidden_size, output_dim = 4, 32, 64

    key = jax.random.PRNGKey(0)
    k_params, k_x = jax.random.split(key)
    torch_params = init_torch_params(k_params, input_dim, hidden_size,
                                     output_dim, O)
    kparams = prepare_kernel_params(torch_params, O)
    bbox = jax.random.normal(k_x, (B, T, O, input_dim), jnp.float32)

    out = object_encoder_forward(bbox, kparams)
    out = jax.block_until_ready(out)

    assert out.shape == (B, output_dim), out.shape
    assert bool(jnp.all(jnp.isfinite(out)))
    ref = reference_forward(bbox, torch_params)
    assert bool(jnp.allclose(out, ref, rtol=5e-2, atol=5e-2)), \
        f"max abs diff = {float(jnp.max(jnp.abs(out - ref)))}"

    print("KERNEL_OK")
</pallas_src>

<mosaic_0001>
module attributes {stable_mosaic.version = 11 : i64} {
  func.func @object_encoder_kernel(%arg0: memref<8x40x256xf32, #tpu.memory_space<vmem>>, %arg1: memref<64x256xbf16, #tpu.memory_space<vmem>>, %arg2: memref<5x64x64xbf16, #tpu.memory_space<vmem>>, %arg3: memref<1x64xf32, #tpu.memory_space<vmem>>, %arg4: memref<8x64xf32, #tpu.memory_space<vmem>>) attributes {dimension_semantics = [], scalar_prefetch = 0 : i64, scratch_operands = 0 : i64, tpu.core_type = #tpu.core_type<tc>} {
    %c0 = arith.constant 0 : index
    %c0_0 = arith.constant 0 : index
    %0 = vector.load %arg1[%c0, %c0_0] : memref<64x256xbf16, #tpu.memory_space<vmem>>, vector<64x256xbf16>
    %cst = arith.constant 0.000000e+00 : f32
    %1 = vector.broadcast %cst : f32 to vector<40x64xf32>
    %cst_1 = arith.constant 0.000000e+00 : f32
    %2 = vector.broadcast %cst_1 : f32 to vector<40x64xf32>
    %c0_i32 = arith.constant 0 : i32
    %3 = arith.index_cast %c0_i32 : i32 to index
    %c0_2 = arith.constant 0 : index
    %c0_3 = arith.constant 0 : index
    %4 = vector.load %arg0[%3, %c0_2, %c0_3] : memref<8x40x256xf32, #tpu.memory_space<vmem>>, vector<1x40x256xf32>
    %5 = vector.shape_cast %4 : vector<1x40x256xf32> to vector<40x256xf32>
    %6 = arith.truncf %1 : vector<40x64xf32> to vector<40x64xbf16>
    %cst_4 = arith.constant dense<0.000000e+00> : vector<40x256xf32>
    %7 = tpu.matmul %6, %0, %cst_4 {dimension_numbers = #tpu.dot_dimension_numbers<[1], [0], [0], [1], [0, 0, 1, 1], [], []>} : vector<40x64xbf16>, vector<64x256xbf16>, vector<40x256xf32> -> vector<40x256xf32>
    %8 = arith.addf %5, %7 : vector<40x256xf32>
    %9 = arith.negf %8 : vector<40x256xf32>
    %10 = math.exp %9 : vector<40x256xf32>
    %cst_5 = arith.constant 1.000000e+00 : f32
    %11 = vector.broadcast %cst_5 : f32 to vector<40x256xf32>
    %12 = arith.addf %11, %10 : vector<40x256xf32>
    %13 = arith.divf %11, %12 : vector<40x256xf32>
    %14 = vector.extract_strided_slice %8 {offsets = [0, 192], sizes = [40, 64], strides = [1, 1]} : vector<40x256xf32> to vector<40x64xf32>
    %15 = math.tanh %14 : vector<40x64xf32>
    %16 = vector.extract_strided_slice %13 {offsets = [0, 0], sizes = [40, 64], strides = [1, 1]} : vector<40x256xf32> to vector<40x64xf32>
    %17 = vector.extract_strided_slice %13 {offsets = [0, 64], sizes = [40, 64], strides = [1, 1]} : vector<40x256xf32> to vector<40x64xf32>
    %18 = vector.extract_strided_slice %13 {offsets = [0, 128], sizes = [40, 64], strides = [1, 1]} : vector<40x256xf32> to vector<40x64xf32>
    %19 = arith.mulf %17, %2 : vector<40x64xf32>
    %20 = arith.mulf %16, %15 : vector<40x64xf32>
    %21 = arith.addf %19, %20 : vector<40x64xf32>
    %22 = math.tanh %21 : vector<40x64xf32>
    %23 = arith.mulf %18, %22 : vector<40x64xf32>
    %c1_i32 = arith.constant 1 : i32
    %24 = arith.index_cast %c1_i32 : i32 to index
    %c0_6 = arith.constant 0 : index
    %c0_7 = arith.constant 0 : index
    %25 = vector.load %arg0[%24, %c0_6, %c0_7] : memref<8x40x256xf32, #tpu.memory_space<vmem>>, vector<1x40x256xf32>
    %26 = vector.shape_cast %25 : vector<1x40x256xf32> to vector<40x256xf32>
    %27 = arith.truncf %23 : vector<40x64xf32> to vector<40x64xbf16>
    %cst_8 = arith.constant dense<0.000000e+00> : vector<40x256xf32>
    %28 = tpu.matmul %27, %0, %cst_8 {dimension_numbers = #tpu.dot_dimension_numbers<[1], [0], [0], [1], [0, 0, 1, 1], [], []>} : vector<40x64xbf16>, vector<64x256xbf16>, vector<40x256xf32> -> vector<40x256xf32>
    %29 = arith.addf %26, %28 : vector<40x256xf32>
    %30 = arith.negf %29 : vector<40x256xf32>
    %31 = math.exp %30 : vector<40x256xf32>
    %cst_9 = arith.constant 1.000000e+00 : f32
    %32 = vector.broadcast %cst_9 : f32 to vector<40x256xf32>
    %33 = arith.addf %32, %31 : vector<40x256xf32>
    %34 = arith.divf %32, %33 : vector<40x256xf32>
    %35 = vector.extract_strided_slice %29 {offsets = [0, 192], sizes = [40, 64], strides = [1, 1]} : vector<40x256xf32> to vector<40x64xf32>
    %36 = math.tanh %35 : vector<40x64xf32>
    %37 = vector.extract_strided_slice %34 {offsets = [0, 0], sizes = [40, 64], strides = [1, 1]} : vector<40x256xf32> to vector<40x64xf32>
    %38 = vector.extract_strided_slice %34 {offsets = [0, 64], sizes = [40, 64], strides = [1, 1]} : vector<40x256xf32> to vector<40x64xf32>
    %39 = vector.extract_strided_slice %34 {offsets = [0, 128], sizes = [40, 64], strides = [1, 1]} : vector<40x256xf32> to vector<40x64xf32>
    %40 = arith.mulf %38, %21 : vector<40x64xf32>
    %41 = arith.mulf %37, %36 : vector<40x64xf32>
    %42 = arith.addf %40, %41 : vector<40x64xf32>
    %43 = math.tanh %42 : vector<40x64xf32>
    %44 = arith.mulf %39, %43 : vector<40x64xf32>
    %c2_i32 = arith.constant 2 : i32
    %45 = arith.index_cast %c2_i32 : i32 to index
    %c0_10 = arith.constant 0 : index
    %c0_11 = arith.constant 0 : index
    %46 = vector.load %arg0[%45, %c0_10, %c0_11] : memref<8x40x256xf32, #tpu.memory_space<vmem>>, vector<1x40x256xf32>
    %47 = vector.shape_cast %46 : vector<1x40x256xf32> to vector<40x256xf32>
    %48 = arith.truncf %44 : vector<40x64xf32> to vector<40x64xbf16>
    %cst_12 = arith.constant dense<0.000000e+00> : vector<40x256xf32>
    %49 = tpu.matmul %48, %0, %cst_12 {dimension_numbers = #tpu.dot_dimension_numbers<[1], [0], [0], [1], [0, 0, 1, 1], [], []>} : vector<40x64xbf16>, vector<64x256xbf16>, vector<40x256xf32> -> vector<40x256xf32>
    %50 = arith.addf %47, %49 : vector<40x256xf32>
    %51 = arith.negf %50 : vector<40x256xf32>
    %52 = math.exp %51 : vector<40x256xf32>
    %cst_13 = arith.constant 1.000000e+00 : f32
    %53 = vector.broadcast %cst_13 : f32 to vector<40x256xf32>
    %54 = arith.addf %53, %52 : vector<40x256xf32>
    %55 = arith.divf %53, %54 : vector<40x256xf32>
    %56 = vector.extract_strided_slice %50 {offsets = [0, 192], sizes = [40, 64], strides = [1, 1]} : vector<40x256xf32> to vector<40x64xf32>
    %57 = math.tanh %56 : vector<40x64xf32>
    %58 = vector.extract_strided_slice %55 {offsets = [0, 0], sizes = [40, 64], strides = [1, 1]} : vector<40x256xf32> to vector<40x64xf32>
    %59 = vector.extract_strided_slice %55 {offsets = [0, 64], sizes = [40, 64], strides = [1, 1]} : vector<40x256xf32> to vector<40x64xf32>
    %60 = vector.extract_strided_slice %55 {offsets = [0, 128], sizes = [40, 64], strides = [1, 1]} : vector<40x256xf32> to vector<40x64xf32>
    %61 = arith.mulf %59, %42 : vector<40x64xf32>
    %62 = arith.mulf %58, %57 : vector<40x64xf32>
    %63 = arith.addf %61, %62 : vector<40x64xf32>
    %64 = math.tanh %63 : vector<40x64xf32>
    %65 = arith.mulf %60, %64 : vector<40x64xf32>
    %c3_i32 = arith.constant 3 : i32
    %66 = arith.index_cast %c3_i32 : i32 to index
    %c0_14 = arith.constant 0 : index
    %c0_15 = arith.constant 0 : index
    %67 = vector.load %arg0[%66, %c0_14, %c0_15] : memref<8x40x256xf32, #tpu.memory_space<vmem>>, vector<1x40x256xf32>
    %68 = vector.shape_cast %67 : vector<1x40x256xf32> to vector<40x256xf32>
    %69 = arith.truncf %65 : vector<40x64xf32> to vector<40x64xbf16>
    %cst_16 = arith.constant dense<0.000000e+00> : vector<40x256xf32>
    %70 = tpu.matmul %69, %0, %cst_16 {dimension_numbers = #tpu.dot_dimension_numbers<[1], [0], [0], [1], [0, 0, 1, 1], [], []>} : vector<40x64xbf16>, vector<64x256xbf16>, vector<40x256xf32> -> vector<40x256xf32>
    %71 = arith.addf %68, %70 : vector<40x256xf32>
    %72 = arith.negf %71 : vector<40x256xf32>
    %73 = math.exp %72 : vector<40x256xf32>
    %cst_17 = arith.constant 1.000000e+00 : f32
    %74 = vector.broadcast %cst_17 : f32 to vector<40x256xf32>
    %75 = arith.addf %74, %73 : vector<40x256xf32>
    %76 = arith.divf %74, %75 : vector<40x256xf32>
    %77 = vector.extract_strided_slice %71 {offsets = [0, 192], sizes = [40, 64], strides = [1, 1]} : vector<40x256xf32> to vector<40x64xf32>
    %78 = math.tanh %77 : vector<40x64xf32>
    %79 = vector.extract_strided_slice %76 {offsets = [0, 0], sizes = [40, 64], strides = [1, 1]} : vector<40x256xf32> to vector<40x64xf32>
    %80 = vector.extract_strided_slice %76 {offsets = [0, 64], sizes = [40, 64], strides = [1, 1]} : vector<40x256xf32> to vector<40x64xf32>
    %81 = vector.extract_strided_slice %76 {offsets = [0, 128], sizes = [40, 64], strides = [1, 1]} : vector<40x256xf32> to vector<40x64xf32>
    %82 = arith.mulf %80, %63 : vector<40x64xf32>
    %83 = arith.mulf %79, %78 : vector<40x64xf32>
    %84 = arith.addf %82, %83 : vector<40x64xf32>
    %85 = math.tanh %84 : vector<40x64xf32>
    %86 = arith.mulf %81, %85 : vector<40x64xf32>
    %c4_i32 = arith.constant 4 : i32
    %87 = arith.index_cast %c4_i32 : i32 to index
    %c0_18 = arith.constant 0 : index
    %c0_19 = arith.constant 0 : index
    %88 = vector.load %arg0[%87, %c0_18, %c0_19] : memref<8x40x256xf32, #tpu.memory_space<vmem>>, vector<1x40x256xf32>
    %89 = vector.shape_cast %88 : vector<1x40x256xf32> to vector<40x256xf32>
    %90 = arith.truncf %86 : vector<40x64xf32> to vector<40x64xbf16>
    %cst_20 = arith.constant dense<0.000000e+00> : vector<40x256xf32>
    %91 = tpu.matmul %90, %0, %cst_20 {dimension_numbers = #tpu.dot_dimension_numbers<[1], [0], [0], [1], [0, 0, 1, 1], [], []>} : vector<40x64xbf16>, vector<64x256xbf16>, vector<40x256xf32> -> vector<40x256xf32>
    %92 = arith.addf %89, %91 : vector<40x256xf32>
    %93 = arith.negf %92 : vector<40x256xf32>
    %94 = math.exp %93 : vector<40x256xf32>
    %cst_21 = arith.constant 1.000000e+00 : f32
    %95 = vector.broadcast %cst_21 : f32 to vector<40x256xf32>
    %96 = arith.addf %95, %94 : vector<40x256xf32>
    %97 = arith.divf %95, %96 : vector<40x256xf32>
    %98 = vector.extract_strided_slice %92 {offsets = [0, 192], sizes = [40, 64], strides = [1, 1]} : vector<40x256xf32> to vector<40x64xf32>
    %99 = math.tanh %98 : vector<40x64xf32>
    %100 = vector.extract_strided_slice %97 {offsets = [0, 0], sizes = [40, 64], strides = [1, 1]} : vector<40x256xf32> to vector<40x64xf32>
    %101 = vector.extract_strided_slice %97 {offsets = [0, 64], sizes = [40, 64], strides = [1, 1]} : vector<40x256xf32> to vector<40x64xf32>
    %102 = vector.extract_strided_slice %97 {offsets = [0, 128], sizes = [40, 64], strides = [1, 1]} : vector<40x256xf32> to vector<40x64xf32>
    %103 = arith.mulf %101, %84 : vector<40x64xf32>
    %104 = arith.mulf %100, %99 : vector<40x64xf32>
    %105 = arith.addf %103, %104 : vector<40x64xf32>
    %106 = math.tanh %105 : vector<40x64xf32>
    %107 = arith.mulf %102, %106 : vector<40x64xf32>
    %c5_i32 = arith.constant 5 : i32
    %108 = arith.index_cast %c5_i32 : i32 to index
    %c0_22 = arith.constant 0 : index
    %c0_23 = arith.constant 0 : index
    %109 = vector.load %arg0[%108, %c0_22, %c0_23] : memref<8x40x256xf32, #tpu.memory_space<vmem>>, vector<1x40x256xf32>
    %110 = vector.shape_cast %109 : vector<1x40x256xf32> to vector<40x256xf32>
    %111 = arith.truncf %107 : vector<40x64xf32> to vector<40x64xbf16>
    %cst_24 = arith.constant dense<0.000000e+00> : vector<40x256xf32>
    %112 = tpu.matmul %111, %0, %cst_24 {dimension_numbers = #tpu.dot_dimension_numbers<[1], [0], [0], [1], [0, 0, 1, 1], [], []>} : vector<40x64xbf16>, vector<64x256xbf16>, vector<40x256xf32> -> vector<40x256xf32>
    %113 = arith.addf %110, %112 : vector<40x256xf32>
    %114 = arith.negf %113 : vector<40x256xf32>
    %115 = math.exp %114 : vector<40x256xf32>
    %cst_25 = arith.constant 1.000000e+00 : f32
    %116 = vector.broadcast %cst_25 : f32 to vector<40x256xf32>
    %117 = arith.addf %116, %115 : vector<40x256xf32>
    %118 = arith.divf %116, %117 : vector<40x256xf32>
    %119 = vector.extract_strided_slice %113 {offsets = [0, 192], sizes = [40, 64], strides = [1, 1]} : vector<40x256xf32> to vector<40x64xf32>
    %120 = math.tanh %119 : vector<40x64xf32>
    %121 = vector.extract_strided_slice %118 {offsets = [0, 0], sizes = [40, 64], strides = [1, 1]} : vector<40x256xf32> to vector<40x64xf32>
    %122 = vector.extract_strided_slice %118 {offsets = [0, 64], sizes = [40, 64], strides = [1, 1]} : vector<40x256xf32> to vector<40x64xf32>
    %123 = vector.extract_strided_slice %118 {offsets = [0, 128], sizes = [40, 64], strides = [1, 1]} : vector<40x256xf32> to vector<40x64xf32>
    %124 = arith.mulf %122, %105 : vector<40x64xf32>
    %125 = arith.mulf %121, %120 : vector<40x64xf32>
    %126 = arith.addf %124, %125 : vector<40x64xf32>
    %127 = math.tanh %126 : vector<40x64xf32>
    %128 = arith.mulf %123, %127 : vector<40x64xf32>
    %c6_i32 = arith.constant 6 : i32
    %129 = arith.index_cast %c6_i32 : i32 to index
    %c0_26 = arith.constant 0 : index
    %c0_27 = arith.constant 0 : index
    %130 = vector.load %arg0[%129, %c0_26, %c0_27] : memref<8x40x256xf32, #tpu.memory_space<vmem>>, vector<1x40x256xf32>
    %131 = vector.shape_cast %130 : vector<1x40x256xf32> to vector<40x256xf32>
    %132 = arith.truncf %128 : vector<40x64xf32> to vector<40x64xbf16>
    %cst_28 = arith.constant dense<0.000000e+00> : vector<40x256xf32>
    %133 = tpu.matmul %132, %0, %cst_28 {dimension_numbers = #tpu.dot_dimension_numbers<[1], [0], [0], [1], [0, 0, 1, 1], [], []>} : vector<40x64xbf16>, vector<64x256xbf16>, vector<40x256xf32> -> vector<40x256xf32>
    %134 = arith.addf %131, %133 : vector<40x256xf32>
    %135 = arith.negf %134 : vector<40x256xf32>
    %136 = math.exp %135 : vector<40x256xf32>
    %cst_29 = arith.constant 1.000000e+00 : f32
    %137 = vector.broadcast %cst_29 : f32 to vector<40x256xf32>
    %138 = arith.addf %137, %136 : vector<40x256xf32>
    %139 = arith.divf %137, %138 : vector<40x256xf32>
    %140 = vector.extract_strided_slice %134 {offsets = [0, 192], sizes = [40, 64], strides = [1, 1]} : vector<40x256xf32> to vector<40x64xf32>
    %141 = math.tanh %140 : vector<40x64xf32>
    %142 = vector.extract_strided_slice %139 {offsets = [0, 0], sizes = [40, 64], strides = [1, 1]} : vector<40x256xf32> to vector<40x64xf32>
    %143 = vector.extract_strided_slice %139 {offsets = [0, 64], sizes = [40, 64], strides = [1, 1]} : vector<40x256xf32> to vector<40x64xf32>
    %144 = vector.extract_strided_slice %139 {offsets = [0, 128], sizes = [40, 64], strides = [1, 1]} : vector<40x256xf32> to vector<40x64xf32>
    %145 = arith.mulf %143, %126 : vector<40x64xf32>
    %146 = arith.mulf %142, %141 : vector<40x64xf32>
    %147 = arith.addf %145, %146 : vector<40x64xf32>
    %148 = math.tanh %147 : vector<40x64xf32>
    %149 = arith.mulf %144, %148 : vector<40x64xf32>
    %c7_i32 = arith.constant 7 : i32
    %150 = arith.index_cast %c7_i32 : i32 to index
    %c0_30 = arith.constant 0 : index
    %c0_31 = arith.constant 0 : index
    %151 = vector.load %arg0[%150, %c0_30, %c0_31] : memref<8x40x256xf32, #tpu.memory_space<vmem>>, vector<1x40x256xf32>
    %152 = vector.shape_cast %151 : vector<1x40x256xf32> to vector<40x256xf32>
    %153 = arith.truncf %149 : vector<40x64xf32> to vector<40x64xbf16>
    %cst_32 = arith.constant dense<0.000000e+00> : vector<40x256xf32>
    %154 = tpu.matmul %153, %0, %cst_32 {dimension_numbers = #tpu.dot_dimension_numbers<[1], [0], [0], [1], [0, 0, 1, 1], [], []>} : vector<40x64xbf16>, vector<64x256xbf16>, vector<40x256xf32> -> vector<40x256xf32>
    %155 = arith.addf %152, %154 : vector<40x256xf32>
    %156 = arith.negf %155 : vector<40x256xf32>
    %157 = math.exp %156 : vector<40x256xf32>
    %cst_33 = arith.constant 1.000000e+00 : f32
    %158 = vector.broadcast %cst_33 : f32 to vector<40x256xf32>
    %159 = arith.addf %158, %157 : vector<40x256xf32>
    %160 = arith.divf %158, %159 : vector<40x256xf32>
    %161 = vector.extract_strided_slice %155 {offsets = [0, 192], sizes = [40, 64], strides = [1, 1]} : vector<40x256xf32> to vector<40x64xf32>
    %162 = math.tanh %161 : vector<40x64xf32>
    %163 = vector.extract_strided_slice %160 {offsets = [0, 0], sizes = [40, 64], strides = [1, 1]} : vector<40x256xf32> to vector<40x64xf32>
    %164 = vector.extract_strided_slice %160 {offsets = [0, 64], sizes = [40, 64], strides = [1, 1]} : vector<40x256xf32> to vector<40x64xf32>
    %165 = vector.extract_strided_slice %160 {offsets = [0, 128], sizes = [40, 64], strides = [1, 1]} : vector<40x256xf32> to vector<40x64xf32>
    %166 = arith.mulf %164, %147 : vector<40x64xf32>
    %167 = arith.mulf %163, %162 : vector<40x64xf32>
    %168 = arith.addf %166, %167 : vector<40x64xf32>
    %169 = math.tanh %168 : vector<40x64xf32>
    %170 = arith.mulf %165, %169 : vector<40x64xf32>
    %c8_i32 = arith.constant 8 : i32
    %cst_34 = arith.constant 0.000000e+00 : f32
    %171 = vector.broadcast %cst_34 : f32 to vector<8x64xf32>
    %172 = vector.extract_strided_slice %170 {offsets = [0, 0], sizes = [8, 64], strides = [1, 1]} : vector<40x64xf32> to vector<8x64xf32>
    %173 = arith.truncf %172 : vector<8x64xf32> to vector<8x64xbf16>
    %c0_35 = arith.constant 0 : index
    %c0_36 = arith.constant 0 : index
    %c0_37 = arith.constant 0 : index
    %174 = vector.load %arg2[%c0_35, %c0_36, %c0_37] : memref<5x64x64xbf16, #tpu.memory_space<vmem>>, vector<1x64x64xbf16>
    %175 = vector.shape_cast %174 : vector<1x64x64xbf16> to vector<64x64xbf16>
    %cst_38 = arith.constant dense<0.000000e+00> : vector<8x64xf32>
    %176 = tpu.matmul %173, %175, %cst_38 {dimension_numbers = #tpu.dot_dimension_numbers<[1], [0], [0], [1], [0, 0, 1, 1], [], []>} : vector<8x64xbf16>, vector<64x64xbf16>, vector<8x64xf32> -> vector<8x64xf32>
    %177 = arith.addf %171, %176 : vector<8x64xf32>
    %178 = vector.extract_strided_slice %170 {offsets = [8, 0], sizes = [8, 64], strides = [1, 1]} : vector<40x64xf32> to vector<8x64xf32>
    %179 = arith.truncf %178 : vector<8x64xf32> to vector<8x64xbf16>
    %c1 = arith.constant 1 : index
    %c0_39 = arith.constant 0 : index
    %c0_40 = arith.constant 0 : index
    %180 = vector.load %arg2[%c1, %c0_39, %c0_40] : memref<5x64x64xbf16, #tpu.memory_space<vmem>>, vector<1x64x64xbf16>
    %181 = vector.shape_cast %180 : vector<1x64x64xbf16> to vector<64x64xbf16>
    %cst_41 = arith.constant dense<0.000000e+00> : vector<8x64xf32>
    %182 = tpu.matmul %179, %181, %cst_41 {dimension_numbers = #tpu.dot_dimension_numbers<[1], [0], [0], [1], [0, 0, 1, 1], [], []>} : vector<8x64xbf16>, vector<64x64xbf16>, vector<8x64xf32> -> vector<8x64xf32>
    %183 = arith.addf %177, %182 : vector<8x64xf32>
    %184 = vector.extract_strided_slice %170 {offsets = [16, 0], sizes = [8, 64], strides = [1, 1]} : vector<40x64xf32> to vector<8x64xf32>
    %185 = arith.truncf %184 : vector<8x64xf32> to vector<8x64xbf16>
    %c2 = arith.constant 2 : index
    %c0_42 = arith.constant 0 : index
    %c0_43 = arith.constant 0 : index
    %186 = vector.load %arg2[%c2, %c0_42, %c0_43] : memref<5x64x64xbf16, #tpu.memory_space<vmem>>, vector<1x64x64xbf16>
    %187 = vector.shape_cast %186 : vector<1x64x64xbf16> to vector<64x64xbf16>
    %cst_44 = arith.constant dense<0.000000e+00> : vector<8x64xf32>
    %188 = tpu.matmul %185, %187, %cst_44 {dimension_numbers = #tpu.dot_dimension_numbers<[1], [0], [0], [1], [0, 0, 1, 1], [], []>} : vector<8x64xbf16>, vector<64x64xbf16>, vector<8x64xf32> -> vector<8x64xf32>
    %189 = arith.addf %183, %188 : vector<8x64xf32>
    %190 = vector.extract_strided_slice %170 {offsets = [24, 0], sizes = [8, 64], strides = [1, 1]} : vector<40x64xf32> to vector<8x64xf32>
    %191 = arith.truncf %190 : vector<8x64xf32> to vector<8x64xbf16>
    %c3 = arith.constant 3 : index
    %c0_45 = arith.constant 0 : index
    %c0_46 = arith.constant 0 : index
    %192 = vector.load %arg2[%c3, %c0_45, %c0_46] : memref<5x64x64xbf16, #tpu.memory_space<vmem>>, vector<1x64x64xbf16>
    %193 = vector.shape_cast %192 : vector<1x64x64xbf16> to vector<64x64xbf16>
    %cst_47 = arith.constant dense<0.000000e+00> : vector<8x64xf32>
    %194 = tpu.matmul %191, %193, %cst_47 {dimension_numbers = #tpu.dot_dimension_numbers<[1], [0], [0], [1], [0, 0, 1, 1], [], []>} : vector<8x64xbf16>, vector<64x64xbf16>, vector<8x64xf32> -> vector<8x64xf32>
    %195 = arith.addf %189, %194 : vector<8x64xf32>
    %196 = vector.extract_strided_slice %170 {offsets = [32, 0], sizes = [8, 64], strides = [1, 1]} : vector<40x64xf32> to vector<8x64xf32>
    %197 = arith.truncf %196 : vector<8x64xf32> to vector<8x64xbf16>
    %c4 = arith.constant 4 : index
    %c0_48 = arith.constant 0 : index
    %c0_49 = arith.constant 0 : index
    %198 = vector.load %arg2[%c4, %c0_48, %c0_49] : memref<5x64x64xbf16, #tpu.memory_space<vmem>>, vector<1x64x64xbf16>
    %199 = vector.shape_cast %198 : vector<1x64x64xbf16> to vector<64x64xbf16>
    %cst_50 = arith.constant dense<0.000000e+00> : vector<8x64xf32>
    %200 = tpu.matmul %197, %199, %cst_50 {dimension_numbers = #tpu.dot_dimension_numbers<[1], [0], [0], [1], [0, 0, 1, 1], [], []>} : vector<8x64xbf16>, vector<64x64xbf16>, vector<8x64xf32> -> vector<8x64xf32>
    %201 = arith.addf %195, %200 : vector<8x64xf32>
    %c0_51 = arith.constant 0 : index
    %c0_52 = arith.constant 0 : index
    %202 = vector.load %arg3[%c0_51, %c0_52] : memref<1x64xf32, #tpu.memory_space<vmem>>, vector<1x64xf32>
    %203 = vector.broadcast %202 : vector<1x64xf32> to vector<8x64xf32>
    %204 = arith.addf %201, %203 : vector<8x64xf32>
    %c0_53 = arith.constant 0 : index
    %c0_54 = arith.constant 0 : index
    %205 = vector.load %arg4[%c0_53, %c0_54] : memref<8x64xf32, #tpu.memory_space<vmem>>, vector<8x64xf32>
    tpu.vector_store %arg4[%c0_53, %c0_54], %204 {strides = array<i32>} : memref<8x64xf32, #tpu.memory_space<vmem>>, vector<8x64xf32>,
    return
  }
}

</mosaic_0001>

<bundles_post_ra>
// kernel: tpu_custom_call.1
= control target key start
LH: loop header
LB: loop body
LE: loop exit
PB: predicated region body
PF: predicated region fallthrough
CT: control target
= control target key end

     0   :  { %9 = vsyncpa [#allocation3], 0  ;;  %s3998_s0 = inlined_call_operand.hbm [shape: f32[8,40,256], index: 0, kind: input, shape index: {}]   ;;  %s3999_s1 = inlined_call_operand.hbm [shape: bf16[64,256], index: 1, kind: input, shape index: {}]   ;;  %s4000_s2 = inlined_call_operand.hbm [shape: bf16[5,64,64], index: 2, kind: input, shape index: {}]   ;;  %s4001_s3 = inlined_call_operand.vmem [shape: f32[1,64], index: 3, kind: input, shape index: {}]   ;;  %s4002_s4 = inlined_call_operand.hbm [shape: f32[8,64], index: 4, kind: output, shape index: {}]  }
   0x1   :  { %10 = vsyncpa [#allocation6], 0 }
   0x2   :  { %11 = vsyncpa [#allocation4], 0  ;;  %s3310_s15 = smov [#allocation5]   ;;  %s3216_s19 = scalar_lea.hbm %s3999_s1, 1024 }
   0x3   :  { %s29_s16 = sshll.u32 %s3310_s15, 4  ;;  %p3217_p0 = scmp.ne.s32.totalorder %s3999_s1, %s3216_s19  ;;  %s30_s16 = int_to_ptr.vmem [resolvable:$true] %s29_s16 }
   0x4   :  { %p3220_p1 = scmp.lt.u32.totalorder %s3216_s19, %s3999_s1 }
   0x6   :  { %p3222_p2 = pnand %p3220_p1, %p3217_p0 }
   0x8   :  { %3225 = shalt.err (!%p3222_p2)
}
   0x9   :  { %s3226_s24 = scalar_lea.vmem %s30_s16, 1024  ;;  %p3231_p4 = scmp.lt.s32.totalorder %s30_s16, %s30_s16 }
   0xa   :  { %p3227_p3 = scmp.ne.s32.totalorder %s30_s16, %s3226_s24  ;;  %p3232_p5 = scmp.lt.s32.totalorder %s3226_s24, %s3226_s24 }
   0xc   :  { %p3233_p6 = por %p3232_p5, %p3231_p4 }
   0xe   :  { %p3234_p7 = pnand %p3233_p6, %p3227_p3 }
  0x10   :  { %3237 = shalt.err (!%p3234_p7)
}
  0x11   :  { %s3311_s25 = smov 128   ;;  %s3312_s26 = smov 8  }
  0x12   :  { %35 = dma.hbm_to_vmem [thread:$0]  %s3999_s1, 1024, %s30_s16, [#allocation6], %s3311_s25, %s3311_s25, %s3312_s26  }
  0x13   :  { %s3313_s29 = smov [#allocation2]   ;;  %s3238_s7 = scalar_lea.hbm %s3998_s0, 10240 }
  0x14   :  { %s17_s30 = sshll.u32 %s3313_s29, 4  ;;  %p3239_p8 = scmp.ne.s32.totalorder %s3998_s0, %s3238_s7  ;;  %s18_s30 = int_to_ptr.vmem [resolvable:$true] %s17_s30 }
  0x15   :  { %p3242_p9 = scmp.lt.u32.totalorder %s3238_s7, %s3998_s0 }
  0x17   :  { %p3244_p10 = pnand %p3242_p9, %p3239_p8 }
  0x19   :  { %3247 = shalt.err (!%p3244_p10)
}
  0x1a   :  { %s3248_s12 = scalar_lea.vmem %s18_s30, 10240  ;;  %p3253_p12 = scmp.lt.s32.totalorder %s18_s30, %s18_s30 }
  0x1b   :  { %p3249_p11 = scmp.ne.s32.totalorder %s18_s30, %s3248_s12  ;;  %p3254_p13 = scmp.lt.s32.totalorder %s3248_s12, %s3248_s12 }
  0x1d   :  { %p3255_p0 = por %p3254_p13, %p3253_p12 }
  0x1f   :  { %p3256_p1 = pnand %p3255_p0, %p3249_p11 }
  0x21   :  { %3259 = shalt.err (!%p3256_p1)
}
  0x22   :  { %s3314_s1 = smov 256   ;;  %s3315_s13 = smov 16  }
  0x23   :  { %23 = dma.hbm_to_vmem [thread:$0]  %s3998_s0, 10240, %s18_s30, [#allocation3], %s3314_s1, %s3314_s1, %s3315_s13  }
  0x24   :  { %s3316_s16 = smov [#allocation7]   ;;  %s3260_s20 = scalar_lea.hbm %s4000_s2, 2560 }
  0x25   :  { %s41_s17 = sshll.u32 %s3316_s16, 4  ;;  %p3261_p2 = scmp.ne.s32.totalorder %s4000_s2, %s3260_s20  ;;  %s42_s17 = int_to_ptr.vmem [resolvable:$true] %s41_s17 }
  0x26   :  { %p3264_p3 = scmp.lt.u32.totalorder %s3260_s20, %s4000_s2 }
  0x28   :  { %p3266_p4 = pnand %p3264_p3, %p3261_p2 }
  0x2a   :  { %3269 = shalt.err (!%p3266_p4)
}
  0x2b   :  { %s3270_s25 = scalar_lea.vmem %s42_s17, 2560  ;;  %p3275_p6 = scmp.lt.s32.totalorder %s42_s17, %s42_s17 }
  0x2c   :  { %p3271_p5 = scmp.ne.s32.totalorder %s42_s17, %s3270_s25  ;;  %p3276_p7 = scmp.lt.s32.totalorder %s3270_s25, %s3270_s25 }
  0x2e   :  { %p3277_p8 = por %p3276_p7, %p3275_p6 }
  0x30   :  { %p3278_p9 = pnand %p3277_p8, %p3271_p5 }
  0x32   :  { %3281 = shalt.err (!%p3278_p9)
}
  0x33   :  { %s3317_s0 = smov 64   ;;  %s3318_s26 = smov 4  }
  0x34   :  { %47 = dma.hbm_to_vmem [thread:$0]  %s4000_s2, 2560, %s42_s17, [#allocation6], %s3317_s0, %s3317_s0, %s3318_s26  }
  0x35   :  { %3304 = dma.done.wait [#allocation3], 10240  }
  0x36   :  { %3305 = vsyncadd [#allocation3], 4294957056 }
  0x37   :  { %3306 = dma.done.wait [#allocation6], 3584  }
  0x38   :  { %3307 = vsyncadd [#allocation6], 4294963712  ;;  %v3319_v0 = vmov 0   ;;  %v3388_v1 = vld [vmem:[#allocation5 + $0x4] ss:$8 sps:$4 sm:$0xff]   ;;  %v71_v14 = vld [vmem:[#allocation2 + $0x18] sm:$0xff] }
  0x39   :  { %154 = vmatprep.mubr.bf16.mxu0 %v3319_v0  ;;  %398 = vmatprep.mubr.bf16.mxu1 %v3319_v0  ;;  %v3390_v2 = vld [vmem:[#allocation5] ss:$8 sps:$4 sm:$0xff]   ;;  %v3393_v3 = vld [vmem:[#allocation5 + $0x14] ss:$8 sps:$4 sm:$0xff]   ;;  %v3397_v4 = vld [vmem:[#allocation5 + $0x10] ss:$8 sps:$4 sm:$0xff]  }
  0x3a   :  { %122 = vmatprep.subr.bf16.mxu0 %v3388_v1  ;;  %366 = vmatprep.subr.bf16.mxu1 %v3388_v1  ;;  %v3401_v5 = vld [vmem:[#allocation5 + $0x24] ss:$8 sps:$4 sm:$0xff]   ;;  %v3404_v6 = vld [vmem:[#allocation5 + $0x20] ss:$8 sps:$4 sm:$0xff]   ;;  %v3406_v7 = vld [vmem:[#allocation5 + $0x34] ss:$8 sps:$4 sm:$0xff]  }
  0x3b   :  { %123 = vmatpush1.bf16.msra.mxu0 %v3390_v2  ;;  %367 = vmatpush1.bf16.msra.mxu1 %v3390_v2  ;;  %v3412_v8 = vld [vmem:[#allocation5 + $0x30] ss:$8 sps:$4 sm:$0xff]   ;;  %v69_v9 = vld [vmem:[#allocation2 + $0x8] sm:$0xff]  ;;  %v68_v36 = vld [vmem:[#allocation2] sm:$0xff]  ;;  %vm118_vm0 = vcmask 523264   ;;  %vm3321_vm1 = vmmov 0  }
  0x3c   :  { %124 = vmatprep.subr.bf16.mxu0 %v3393_v3  ;;  %368 = vmatprep.subr.bf16.mxu1 %v3393_v3  ;;  %v73_v17 = vld [vmem:[#allocation2 + $0x28] sm:$0xff]  ;;  %v75_v22 = vld [vmem:[#allocation2 + $0x38] sm:$0xff]  ;;  %v70_v38 = vld [vmem:[#allocation2 + $0x10] sm:$0xff]  ;;  %s3322_s30 = smov [#allocation8]  }
  0x3d   :  { %v77_v27 = vld [vmem:[#allocation2 + $0x48] sm:$0xff]  ;;  %v72_v41 = vld [vmem:[#allocation2 + $0x20] sm:$0xff]  ;;  %v74_v44 = vld [vmem:[#allocation2 + $0x30] sm:$0xff]  ;;  %s2453_s5 = sshll.u32 %s3322_s30, 4  ;;  %s2454_s5 = int_to_ptr.vmem [resolvable:$true] %s2453_s5 }
  0x3e   :  { %v76_v48 = vld [vmem:[#allocation2 + $0x40] sm:$0xff]  ;;  %s3282_s6 = scalar_lea.vmem %s2454_s5, 128  ;;  %p3287_p11 = scmp.lt.s32.totalorder %s2454_s5, %s2454_s5 }
  0x3f   :  { %125 = vmatpush1.bf16.msra.mxu0 %v3397_v4  ;;  %369 = vmatpush1.bf16.msra.mxu1 %v3397_v4  ;;  %p3283_p10 = scmp.ne.s32.totalorder %s2454_s5, %s3282_s6  ;;  %p3288_p12 = scmp.lt.s32.totalorder %s3282_s6, %s3282_s6 }
  0x40   :  { %126 = vmatprep.subr.bf16.mxu0 %v3401_v5  ;;  %370 = vmatprep.subr.bf16.mxu1 %v3401_v5 }
  0x41   :  { %p3289_p13 = por %p3288_p12, %p3287_p11 }
  0x43   :  { %127 = vmatpush1.bf16.msra.mxu0 %v3404_v6  ;;  %371 = vmatpush1.bf16.msra.mxu1 %v3404_v6  ;;  %p3290_p0 = pnand %p3289_p13, %p3283_p10 }
  0x44   :  { %128 = vmatprep.subr.bf16.mxu0 %v3406_v7  ;;  %372 = vmatprep.subr.bf16.mxu1 %v3406_v7 }
  0x47   :  { %129 = vmatpush1.bf16.msra.mxu0 %v3412_v8  ;;  %373 = vmatpush1.bf16.msra.mxu1 %v3412_v8 }
  0x48   :  { %610 = vmatprep.subr.bf16.mxu0 %v3388_v1  ;;  %854 = vmatprep.subr.bf16.mxu1 %v3388_v1 }
  0x4a   :  { %155 = vmatmul.mubr.bf16.vlgmr.msra.gmra.mrb[0].mxu0 %v3319_v0 }
  0x4b   :  { %164 = vmatprep.mubr.bf16.mxu0 %v3319_v0  ;;  %611 = vmatpush1.bf16.msra.mxu0 %v3390_v2 }
  0x4c   :  { %612 = vmatprep.subr.bf16.mxu0 %v3393_v3 }
  0x4f   :  { %613 = vmatpush1.bf16.msra.mxu0 %v3397_v4 }
  0x50   :  { %614 = vmatprep.subr.bf16.mxu0 %v3401_v5 }
  0x52   :  { %165 = vmatmul.mubr.bf16.gmra.mrb[4].mxu0 %v3319_v0 }
  0x53   :  { %174 = vmatprep.mubr.bf16.mxu0 %v3319_v0  ;;  %615 = vmatpush1.bf16.msra.mxu0 %v3404_v6 }
  0x54   :  { %616 = vmatprep.subr.bf16.mxu0 %v3406_v7 }
  0x57   :  { %617 = vmatpush1.bf16.msra.mxu0 %v3412_v8 }
  0x58   :  { %1098 = vmatprep.subr.bf16.mxu0 %v3388_v1 }
  0x5a   :  { %175 = vmatmul.mubr.bf16.gmra.mrb[8].mxu0 %v3319_v0 }
  0x5b   :  { %642 = vmatprep.mubr.bf16.mxu0 %v3319_v0 }
 0x11d   :  { %v156_v10 = vpop.f32.mrb[0].mxu0 }
 0x11e   :  { %v158_v11 = vpop.f32.mrb[1].mxu0  ;;  %v183_v37 = vadd.f32 %v156_v10, %v68_v36 }
 0x11f   :  { %v3436_v12 = vadd.f32 %v158_v11, %v69_v9  ;;  %v160_v13 = vpop.f32.mrb[2].mxu0 }
 0x120   :  { %v162_v15 = vpop.f32.mrb[3].mxu0  ;;  %v2471_v39 = vmul.f32 -1.442695, %v183_v37  ;;  %v185_v40 = vadd.f32 %v160_v13, %v70_v38 }
 0x121   :  { %2728 = vtanh.f32 %v3436_v12  ;;  %v3439_v16 = vadd.f32 %v162_v15, %v71_v14 }
 0x122   :  { %v2473_v43 = vmul.f32 -1.442695, %v185_v40 }
 0x123   :  { %2730 = vtanh.f32 %v3439_v16 }
 0x125   :  { %v166_v18 = vpop.f32.mrb[4].mxu0 }
 0x126   :  { %v168_v19 = vpop.f32.mrb[5].mxu0  ;;  %v187_v42 = vadd.f32 %v166_v18, %v72_v41 }
 0x127   :  { %v3442_v20 = vadd.f32 %v168_v19, %v73_v17  ;;  %v170_v21 = vpop.f32.mrb[6].mxu0 }
 0x128   :  { %v172_v23 = vpop.f32.mrb[7].mxu0  ;;  %v2475_v45 = vmul.f32 -1.442695, %v187_v42  ;;  %v189_v46 = vadd.f32 %v170_v21, %v74_v44 }
 0x129   :  { %2732 = vtanh.f32 %v3442_v20  ;;  %v3445_v24 = vadd.f32 %v172_v23, %v75_v22 }
 0x12a   :  { %v2477_v47 = vmul.f32 -1.442695, %v189_v46  ;;  %v2472_v46 = vmul.f32 -1.442695, %v3436_v12 }
 0x12b   :  { %v2729_v25 = vpop.eup %2728  ;;  %2734 = vtanh.f32 %v3445_v24 }
 0x12c   :  { %268 = vrot.lane.b32.xlu0 %v2729_v25, %s3317_s0 }
 0x12d   :  { %v176_v26 = vpop.f32.mrb[8].mxu0  ;;  %v2731_v30 = vpop.eup %2730 }
 0x12e   :  { %v178_v28 = vpop.f32.mrb[9].mxu0  ;;  %v191_v50 = vadd.f32 %v176_v26, %v76_v48  ;;  %v2476_v48 = vmul.f32 -1.442695, %v3442_v20 }
 0x12f   :  { %v180_v29 = vpop.f32.mrb[10].mxu0  ;;  %v3449_v32 = vadd.f32 %v178_v28, %v77_v27 }
 0x130   :  { %v181_v31 = vpop.f32.mrb[11].mxu0  ;;  %270 = vrot.lane.b32.xlu0 %v2731_v30, %s3317_s0  ;;  %v2479_v53 = vmul.f32 -1.442695, %v191_v50 }
 0x131   :  { %2736 = vtanh.f32 %v3449_v32 }
 0x132   :  { %2738 = vpow2.f32 %v2471_v39 }
 0x133   :  { %v2733_v33 = vpop.eup %2732  ;;  %2740 = vpow2.f32 %v2473_v43 }
 0x134   :  { %272 = vrot.lane.b32.xlu1 %v2733_v33, %s3317_s0  ;;  %2742 = vpow2.f32 %v2475_v45 }
 0x135   :  { %v2735_v34 = vpop.eup %2734  ;;  %2744 = vpow2.f32 %v2477_v47  ;;  %v2474_v47 = vmul.f32 -1.442695, %v3439_v16 }
 0x138   :  { %274 = vrot.lane.b32.xlu1 %v2735_v34, %s3317_s0 }
 0x13b   :  { %v2737_v35 = vpop.eup %2736 }
 0x13c   :  { %276 = vrot.lane.b32.xlu0 %v2737_v35, %s3317_s0  ;;  %v2739_v49 = vpop.eup %2738 }
 0x13d   :  { %v223_v51 = vadd.f32 1.0, %v2739_v49  ;;  %v2741_v52 = vpop.eup %2740  ;;  %v2478_v49 = vmul.f32 -1.442695, %v3445_v24 }
 0x13e   :  { %v2743_v54 = vpop.eup %2742  ;;  %v225_v55 = vadd.f32 1.0, %v2741_v52  ;;  %v2480_v52 = vmul.f32 -1.442695, %v3449_v32 }
 0x13f   :  { %2746 = vrcp.f32 %v223_v51  ;;  %v227_v56 = vadd.f32 1.0, %v2743_v54  ;;  %v2745_v57 = vpop.eup %2744 }
 0x140   :  { %2748 = vpow2.f32 %v2479_v53  ;;  %v229_v58 = vadd.f32 1.0, %v2745_v57 }
 0x141   :  { %2750 = vrcp.f32 %v225_v55 }
 0x142   :  { %2752 = vrcp.f32 %v227_v56 }
 0x143   :  { %2754 = vrcp.f32 %v229_v58 }
 0x149   :  { %v2747_v59 = vpop.eup %2746 }
 0x14a   :  { %v2749_v62 = vpop.eup %2748  ;;  %v258_v25 = vmul.f32 0.0, %v2747_v59 }
 0x14b   :  { %v2751_v63 = vpop.eup %2750  ;;  %v231_v10 = vadd.f32 1.0, %v2749_v62 }
 0x14c   :  { %v2753_v13 = vpop.eup %2752  ;;  %v259_v28 = vmul.f32 0.0, %v2751_v63 }
 0x14d   :  { %2756 = vrcp.f32 %v231_v10  ;;  %v2755_v17 = vpop.eup %2754  ;;  %v260_v31 = vmul.f32 0.0, %v2753_v13 }
 0x14e   :  { %v261_v35 = vmul.f32 0.0, %v2755_v17 }
 0x157   :  { %v2757_v21 = vpop.eup %2756 }
 0x158   :  { %v262_v40 = vmul.f32 0.0, %v2757_v21 }
 0x19e   :  { %v269_v60 = vpop.permute.xlu0 %268 }
 0x19f   :  { %v283_v61 = vmul.f32 %v2747_v59, %v269_v60 }
 0x1a1   :  { %293 = vrot.lane.b32.xlu1 %v283_v61, %s3317_s0 }
 0x1a2   :  { %v271_v9 = vpop.permute.xlu0 %270 }
 0x1a3   :  { %v284_v11 = vmul.f32 %v2751_v63, %v271_v9 }
 0x1a5   :  { %295 = vrot.lane.b32.xlu0 %v284_v11, %s3317_s0 }
 0x1a6   :  { %v273_v14 = vpop.permute.xlu1 %272 }
 0x1a7   :  { %v285_v15 = vmul.f32 %v2753_v13, %v273_v14 }
 0x1a9   :  { %297 = vrot.lane.b32.xlu1 %v285_v15, %s3317_s0 }
 0x1aa   :  { %v275_v18 = vpop.permute.xlu1 %274 }
 0x1ab   :  { %v286_v19 = vmul.f32 %v2755_v17, %v275_v18 }
 0x1ad   :  { %299 = vrot.lane.b32.xlu0 %v286_v19, %s3317_s0 }
 0x1ae   :  { %v277_v22 = vpop.permute.xlu0 %276 }
 0x1af   :  { %v287_v23 = vmul.f32 %v2757_v21, %v277_v22  ;;  %v345_v22 = vld [vmem:[#allocation2 + $0x58] sm:$0xff] }
 0x1b1   :  { %301 = vrot.lane.b32.xlu1 %v287_v23, %s3317_s0 }
 0x213   :  { %v294_v26 = vpop.permute.xlu1 %293 }
 0x214   :  { %v3461_v27 = vadd.f32 %v294_v26, %v258_v25 }
 0x216   :  { %2758 = vtanh.f32 %v3461_v27 }
 0x217   :  { %v296_v29 = vpop.permute.xlu0 %295 }
 0x218   :  { %v3464_v30 = vadd.f32 %v296_v29, %v259_v28  ;;  %v347_v29 = vld [vmem:[#allocation2 + $0x68] sm:$0xff] }
 0x21a   :  { %2760 = vtanh.f32 %v3464_v30 }
 0x21b   :  { %v298_v33 = vpop.permute.xlu1 %297 }
 0x21c   :  { %v3467_v34 = vadd.f32 %v298_v33, %v260_v31 }
 0x21e   :  { %2762 = vtanh.f32 %v3467_v34 }
 0x21f   :  { %v300_v37 = vpop.permute.xlu0 %299 }
 0x220   :  { %v2759_v36 = vpop.eup %2758  ;;  %v3470_v38 = vadd.f32 %v300_v37, %v261_v35  ;;  %v349_v35 = vld [vmem:[#allocation2 + $0x78] sm:$0xff] }
 0x221   :  { %323 = vrot.lane.b32.xlu0 %v2759_v36, %s3317_s0 }
 0x222   :  { %2764 = vtanh.f32 %v3470_v38 }
 0x223   :  { %v302_v41 = vpop.permute.xlu1 %301 }
 0x224   :  { %v2761_v39 = vpop.eup %2760  ;;  %v3475_v43 = vadd.f32 %v302_v41, %v262_v40  ;;  %v351_v41 = vld [vmem:[#allocation2 + $0x88] sm:$0xff] }
 0x225   :  { %325 = vrot.lane.b32.xlu1 %v2761_v39, %s3317_s0 }
 0x226   :  { %2766 = vtanh.f32 %v3475_v43 }
 0x227   :  { %2768 = vpow2.f32 %v2472_v46 }
 0x228   :  { %v2763_v42 = vpop.eup %2762  ;;  %2770 = vpow2.f32 %v2474_v47  ;;  %v353_v47 = vld [vmem:[#allocation2 + $0x98] sm:$0xff] }
 0x229   :  { %327 = vrot.lane.b32.xlu0 %v2763_v42, %s3317_s0  ;;  %2772 = vpow2.f32 %v2476_v48 }
 0x22a   :  { %2774 = vpow2.f32 %v2478_v49 }
 0x22b   :  { %2776 = vpow2.f32 %v2480_v52 }
 0x22c   :  { %v2765_v44 = vpop.eup %2764 }
 0x22d   :  { %329 = vrot.lane.b32.xlu1 %v2765_v44, %s3317_s0 }
 0x230   :  { %v2767_v45 = vpop.eup %2766 }
 0x231   :  { %331 = vrot.lane.b32.xlu0 %v2767_v45, %s3317_s0  ;;  %v2769_v50 = vpop.eup %2768 }
 0x232   :  { %v2771_v51 = vpop.eup %2770  ;;  %v224_v53 = vadd.f32 1.0, %v2769_v50 }
 0x233   :  { %v226_v54 = vadd.f32 1.0, %v2771_v51  ;;  %v2773_v55 = vpop.eup %2772 }
 0x234   :  { %2778 = vrcp.f32 %v224_v53  ;;  %v2775_v12 = vpop.eup %2774  ;;  %v228_v16 = vadd.f32 1.0, %v2773_v55 }
 0x235   :  { %2780 = vrcp.f32 %v226_v54  ;;  %v230_v56 = vadd.f32 1.0, %v2775_v12  ;;  %v2777_v57 = vpop.eup %2776  ;;  %v344_v12 = vld [vmem:[#allocation2 + $0x50] sm:$0xff] }
 0x236   :  { %2782 = vrcp.f32 %v228_v16  ;;  %v232_v60 = vadd.f32 1.0, %v2777_v57 }
 0x237   :  { %2784 = vrcp.f32 %v230_v56  ;;  %v346_v56 = vld [vmem:[#allocation2 + $0x60] sm:$0xff] }
 0x238   :  { %2786 = vrcp.f32 %v232_v60  ;;  %v350_v60 = vld [vmem:[#allocation2 + $0x80] sm:$0xff] }
 0x23e   :  { %v2779_v24 = vpop.eup %2778 }
 0x23f   :  { %v2781_v58 = vpop.eup %2780 }
 0x240   :  { %v2783_v9 = vpop.eup %2782 }
 0x241   :  { %v2785_v10 = vpop.eup %2784 }
 0x242   :  { %v2787_v17 = vpop.eup %2786 }
 0x293   :  { %v324_v20 = vpop.permute.xlu0 %323 }
 0x294   :  { %v338_v61 = vmul.f32 %v2779_v24, %v324_v20  ;;  %v348_v24 = vld [vmem:[#allocation2 + $0x70] sm:$0xff] }
 0x297   :  { %v326_v59 = vpop.permute.xlu1 %325 }
 0x298   :  { %v339_v62 = vmul.f32 %v2781_v58, %v326_v59 }
 0x29a   :  { %v354_v32 = vpack.c.bf16 %v339_v62, %v338_v61 }
 0x29b   :  { %v328_v63 = vpop.permute.xlu0 %327 }
 0x29c   :  { %2481 = vmatmul.mubr.msk.bf16.vlgmr.msra.gmra.mrb[0].mxu1 %vm118_vm0, %v354_v32  ;;  %v340_v13 = vmul.f32 %v2783_v9, %v328_v63  ;;  %v352_v63 = vld [vmem:[#allocation2 + $0x90] sm:$0xff] }
 0x29d   :  { %408 = vmatprep.mubr.bf16.mxu1 %v3319_v0  ;;  %855 = vmatpush1.bf16.msra.mxu1 %v3390_v2 }
 0x29e   :  { %856 = vmatprep.subr.bf16.mxu1 %v3393_v3 }
 0x29f   :  { %v330_v11 = vpop.permute.xlu1 %329 }
 0x2a0   :  { %v341_v14 = vmul.f32 %v2785_v10, %v330_v11 }
 0x2a1   :  { %857 = vmatpush1.bf16.msra.mxu1 %v3397_v4 }
 0x2a2   :  { %v355_v15 = vpack.c.bf16 %v341_v14, %v340_v13  ;;  %858 = vmatprep.subr.bf16.mxu1 %v3401_v5 }
 0x2a3   :  { %v332_v18 = vpop.permute.xlu0 %331 }
 0x2a4   :  { %2482 = vmatmul.mubr.msk.bf16.gmra.mrb[4].mxu1 %vm118_vm0, %v355_v15  ;;  %v342_v19 = vmul.f32 %v2787_v17, %v332_v18 }
 0x2a5   :  { %418 = vmatprep.mubr.bf16.mxu1 %v3319_v0  ;;  %859 = vmatpush1.bf16.msra.mxu1 %v3404_v6 }
 0x2a6   :  { %860 = vmatprep.subr.bf16.mxu1 %v3406_v7  ;;  %v356_v21 = vpack.c.bf16 %v342_v19, %v342_v19 }
 0x2a9   :  { %861 = vmatpush1.bf16.msra.mxu1 %v3412_v8 }
 0x2aa   :  { %1342 = vmatprep.subr.bf16.mxu1 %v3388_v1 }
 0x2ac   :  { %2483 = vmatmul.mubr.msk.bf16.gmra.mrb[8].mxu1 %vm118_vm0, %v356_v21 }
 0x2ad   :  { %886 = vmatprep.mubr.bf16.mxu1 %v3319_v0 }
 0x36f   :  { %v400_v23 = vpop.f32.mrb[0].mxu1 }
 0x370   :  { %v402_v25 = vpop.f32.mrb[1].mxu1  ;;  %v427_v16 = vadd.f32 %v400_v23, %v344_v12 }
 0x371   :  { %v3500_v26 = vadd.f32 %v402_v25, %v345_v22  ;;  %v404_v28 = vpop.f32.mrb[2].mxu1 }
 0x372   :  { %v406_v31 = vpop.f32.mrb[3].mxu1  ;;  %v2484_v57 = vmul.f32 -1.442695, %v427_v16  ;;  %v429_v20 = vadd.f32 %v404_v28, %v346_v56 }
 0x373   :  { %2788 = vtanh.f32 %v3500_v26  ;;  %v3503_v33 = vadd.f32 %v406_v31, %v347_v29 }
 0x374   :  { %v2486_v59 = vmul.f32 -1.442695, %v429_v20 }
 0x375   :  { %2790 = vtanh.f32 %v3503_v33 }
 0x377   :  { %v410_v36 = vpop.f32.mrb[4].mxu1 }
 0x378   :  { %v412_v37 = vpop.f32.mrb[5].mxu1  ;;  %v431_v58 = vadd.f32 %v410_v36, %v348_v24 }
 0x379   :  { %v3506_v39 = vadd.f32 %v412_v37, %v349_v35  ;;  %v414_v40 = vpop.f32.mrb[6].mxu1 }
 0x37a   :  { %v416_v42 = vpop.f32.mrb[7].mxu1  ;;  %v2488_v61 = vmul.f32 -1.442695, %v431_v58  ;;  %v433_v62 = vadd.f32 %v414_v40, %v350_v60 }
 0x37b   :  { %2792 = vtanh.f32 %v3506_v39  ;;  %v3509_v44 = vadd.f32 %v416_v42, %v351_v41 }
 0x37c   :  { %v2490_v32 = vmul.f32 -1.442695, %v433_v62 }
 0x37d   :  { %v2789_v45 = vpop.eup %2788  ;;  %2794 = vtanh.f32 %v3509_v44 }
 0x37e   :  { %512 = vrot.lane.b32.xlu1 %v2789_v45, %s3317_s0 }
 0x37f   :  { %v420_v46 = vpop.f32.mrb[8].mxu1  ;;  %v2791_v50 = vpop.eup %2790 }
 0x380   :  { %v422_v48 = vpop.f32.mrb[9].mxu1  ;;  %514 = vrot.lane.b32.xlu0 %v2791_v50, %s3317_s0  ;;  %v435_v10 = vadd.f32 %v420_v46, %v352_v63  ;;  %v2489_v63 = vmul.f32 -1.442695, %v3506_v39 }
 0x381   :  { %v424_v49 = vpop.f32.mrb[10].mxu1  ;;  %v3514_v52 = vadd.f32 %v422_v48, %v353_v47 }
 0x382   :  { %v425_v51 = vpop.f32.mrb[11].mxu1  ;;  %v2492_v14 = vmul.f32 -1.442695, %v435_v10 }
 0x383   :  { %2796 = vtanh.f32 %v3514_v52 }
 0x384   :  { %2798 = vpow2.f32 %v2484_v57 }
 0x385   :  { %v2793_v53 = vpop.eup %2792  ;;  %2800 = vpow2.f32 %v2486_v59 }
 0x386   :  { %516 = vrot.lane.b32.xlu1 %v2793_v53, %s3317_s0  ;;  %2802 = vpow2.f32 %v2488_v61 }
 0x387   :  { %v2795_v54 = vpop.eup %2794  ;;  %2804 = vpow2.f32 %v2490_v32  ;;  %v2485_v32 = vmul.f32 -1.442695, %v3500_v26 }
 0x388   :  { %518 = vrot.lane.b32.xlu0 %v2795_v54, %s3317_s0 }
 0x38d   :  { %v2797_v55 = vpop.eup %2796 }
 0x38e   :  { %520 = vrot.lane.b32.xlu1 %v2797_v55, %s3317_s0  ;;  %v2799_v9 = vpop.eup %2798 }
 0x38f   :  { %v467_v11 = vadd.f32 1.0, %v2799_v9  ;;  %v2801_v13 = vpop.eup %2800  ;;  %v2491_v9 = vmul.f32 -1.442695, %v3509_v44 }
 0x390   :  { %v2803_v15 = vpop.eup %2802  ;;  %v469_v17 = vadd.f32 1.0, %v2801_v13  ;;  %v2493_v13 = vmul.f32 -1.442695, %v3514_v52 }
 0x391   :  { %2806 = vrcp.f32 %v467_v11  ;;  %v471_v18 = vadd.f32 1.0, %v2803_v15  ;;  %v2805_v19 = vpop.eup %2804 }
 0x392   :  { %2808 = vpow2.f32 %v2492_v14  ;;  %v473_v21 = vadd.f32 1.0, %v2805_v19 }
 0x393   :  { %2810 = vrcp.f32 %v469_v17 }
 0x394   :  { %2812 = vrcp.f32 %v471_v18 }
 0x395   :  { %2814 = vrcp.f32 %v473_v21 }
 0x39b   :  { %v2807_v22 = vpop.eup %2806 }
 0x39c   :  { %v2809_v28 = vpop.eup %2808  ;;  %v502_v50 = vmul.f32 %v2807_v22, %v3461_v27 }
 0x39d   :  { %v2811_v29 = vpop.eup %2810  ;;  %v475_v35 = vadd.f32 1.0, %v2809_v28 }
 0x39e   :  { %v2813_v37 = vpop.eup %2812  ;;  %v503_v54 = vmul.f32 %v2811_v29, %v3464_v30 }
 0x39f   :  { %2816 = vrcp.f32 %v475_v35  ;;  %v2815_v42 = vpop.eup %2814  ;;  %v504_v16 = vmul.f32 %v2813_v37, %v3467_v34 }
 0x3a0   :  { %v505_v27 = vmul.f32 %v2815_v42, %v3470_v38 }
 0x3a9   :  { %v2817_v47 = vpop.eup %2816 }
 0x3aa   :  { %v506_v34 = vmul.f32 %v2817_v47, %v3475_v43  ;;  %v2487_v43 = vmul.f32 -1.442695, %v3503_v33 }
 0x3f0   :  { %v513_v23 = vpop.permute.xlu1 %512 }
 0x3f1   :  { %v527_v25 = vmul.f32 %v2807_v22, %v513_v23 }
 0x3f2   :  { %v515_v31 = vpop.permute.xlu0 %514 }
 0x3f3   :  { %537 = vrot.lane.b32.xlu0 %v527_v25, %s3317_s0  ;;  %v528_v36 = vmul.f32 %v2811_v29, %v515_v31 }
 0x3f5   :  { %539 = vrot.lane.b32.xlu1 %v528_v36, %s3317_s0 }
 0x3f8   :  { %v517_v40 = vpop.permute.xlu1 %516 }
 0x3f9   :  { %v529_v41 = vmul.f32 %v2813_v37, %v517_v40 }
 0x3fa   :  { %v519_v45 = vpop.permute.xlu0 %518 }
 0x3fb   :  { %541 = vrot.lane.b32.xlu0 %v529_v41, %s3317_s0  ;;  %v530_v46 = vmul.f32 %v2815_v42, %v519_v45 }
 0x3fd   :  { %543 = vrot.lane.b32.xlu1 %v530_v46, %s3317_s0 }
 0x400   :  { %v521_v48 = vpop.permute.xlu1 %520 }
 0x401   :  { %v531_v49 = vmul.f32 %v2817_v47, %v521_v48  ;;  %v591_v48 = vld [vmem:[#allocation2 + $0xb8] sm:$0xff] }
 0x403   :  { %545 = vrot.lane.b32.xlu0 %v531_v49, %s3317_s0 }
 0x465   :  { %v538_v51 = vpop.permute.xlu0 %537 }
 0x466   :  { %v3526_v53 = vadd.f32 %v538_v51, %v502_v50 }
 0x467   :  { %v540_v55 = vpop.permute.xlu1 %539 }
 0x468   :  { %2818 = vtanh.f32 %v3526_v53  ;;  %v3530_v12 = vadd.f32 %v540_v55, %v503_v54  ;;  %v595_v55 = vld [vmem:[#allocation2 + $0xd8] sm:$0xff] }
 0x46a   :  { %2820 = vtanh.f32 %v3530_v12 }
 0x46d   :  { %v542_v56 = vpop.permute.xlu0 %541 }
 0x46e   :  { %v3534_v57 = vadd.f32 %v542_v56, %v504_v16 }
 0x46f   :  { %v544_v24 = vpop.permute.xlu1 %543 }
 0x470   :  { %2822 = vtanh.f32 %v3534_v57  ;;  %v3538_v58 = vadd.f32 %v544_v24, %v505_v27  ;;  %v597_v24 = vld [vmem:[#allocation2 + $0xe8] sm:$0xff] }
 0x472   :  { %v2819_v20 = vpop.eup %2818  ;;  %2824 = vtanh.f32 %v3538_v58 }
 0x473   :  { %567 = vrot.lane.b32.xlu1 %v2819_v20, %s3317_s0 }
 0x474   :  { %v2821_v30 = vpop.eup %2820 }
 0x475   :  { %569 = vrot.lane.b32.xlu0 %v2821_v30, %s3317_s0  ;;  %v546_v59 = vpop.permute.xlu0 %545 }
 0x476   :  { %v3544_v61 = vadd.f32 %v546_v59, %v506_v34 }
 0x478   :  { %2826 = vtanh.f32 %v3544_v61 }
 0x479   :  { %2828 = vpow2.f32 %v2485_v32 }
 0x47a   :  { %v2823_v60 = vpop.eup %2822  ;;  %2830 = vpow2.f32 %v2487_v43 }
 0x47b   :  { %571 = vrot.lane.b32.xlu1 %v2823_v60, %s3317_s0  ;;  %2832 = vpow2.f32 %v2489_v63  ;;  %v588_v63 = vld [vmem:[#allocation2 + $0xa0] sm:$0xff] }
 0x47c   :  { %v2825_v38 = vpop.eup %2824  ;;  %2834 = vpow2.f32 %v2491_v9 }
 0x47d   :  { %573 = vrot.lane.b32.xlu0 %v2825_v38, %s3317_s0  ;;  %2836 = vpow2.f32 %v2493_v13 }
 0x482   :  { %v2827_v62 = vpop.eup %2826 }
 0x483   :  { %575 = vrot.lane.b32.xlu1 %v2827_v62, %s3317_s0  ;;  %v2829_v10 = vpop.eup %2828 }
 0x484   :  { %v2831_v11 = vpop.eup %2830  ;;  %v468_v14 = vadd.f32 1.0, %v2829_v10  ;;  %v590_v10 = vld [vmem:[#allocation2 + $0xb0] sm:$0xff] }
 0x485   :  { %v470_v15 = vadd.f32 1.0, %v2831_v11  ;;  %v2833_v17 = vpop.eup %2832 }
 0x486   :  { %2838 = vrcp.f32 %v468_v14  ;;  %v2835_v26 = vpop.eup %2834  ;;  %v472_v33 = vadd.f32 1.0, %v2833_v17  ;;  %v592_v14 = vld [vmem:[#allocation2 + $0xc0] sm:$0xff] }
 0x487   :  { %2840 = vrcp.f32 %v470_v15  ;;  %v474_v18 = vadd.f32 1.0, %v2835_v26  ;;  %v2837_v19 = vpop.eup %2836  ;;  %v594_v26 = vld [vmem:[#allocation2 + $0xd0] sm:$0xff] }
 0x488   :  { %2842 = vrcp.f32 %v472_v33  ;;  %v476_v23 = vadd.f32 1.0, %v2837_v19 }
 0x489   :  { %2844 = vrcp.f32 %v474_v18 }
 0x48a   :  { %2846 = vrcp.f32 %v476_v23 }
 0x490   :  { %v2839_v44 = vpop.eup %2838 }
 0x491   :  { %v2841_v21 = vpop.eup %2840 }
 0x492   :  { %v2843_v31 = vpop.eup %2842 }
 0x493   :  { %v2845_v35 = vpop.eup %2844 }
 0x494   :  { %v2847_v42 = vpop.eup %2846 }
 0x4e5   :  { %v568_v39 = vpop.permute.xlu1 %567 }
 0x4e6   :  { %v582_v25 = vmul.f32 %v2839_v44, %v568_v39  ;;  %v596_v39 = vld [vmem:[#allocation2 + $0xe0] sm:$0xff] }
 0x4e7   :  { %v570_v22 = vpop.permute.xlu0 %569 }
 0x4e8   :  { %v583_v28 = vmul.f32 %v2841_v21, %v570_v22 }
 0x4ea   :  { %v598_v52 = vpack.c.bf16 %v583_v28, %v582_v25 }
 0x4ec   :  { %2494 = vmatmul.mubr.msk.bf16.vlgmr.msra.gmra.mrb[12].mxu0 %vm118_vm0, %v598_v52 }
 0x4ed   :  { %v572_v29 = vpop.permute.xlu1 %571  ;;  %652 = vmatprep.mubr.bf16.mxu0 %v3319_v0  ;;  %1099 = vmatpush1.bf16.msra.mxu0 %v3390_v2 }
 0x4ee   :  { %1100 = vmatprep.subr.bf16.mxu0 %v3393_v3  ;;  %v584_v37 = vmul.f32 %v2843_v31, %v572_v29 }
 0x4ef   :  { %v574_v36 = vpop.permute.xlu0 %573 }
 0x4f0   :  { %v585_v40 = vmul.f32 %v2845_v35, %v574_v36 }
 0x4f1   :  { %1101 = vmatpush1.bf16.msra.mxu0 %v3397_v4  ;;  %v589_v4 = vld [vmem:[#allocation2 + $0xa8] sm:$0xff] }
 0x4f2   :  { %v599_v41 = vpack.c.bf16 %v585_v40, %v584_v37  ;;  %1102 = vmatprep.subr.bf16.mxu0 %v3401_v5 }
 0x4f4   :  { %2495 = vmatmul.mubr.msk.bf16.gmra.mrb[16].mxu0 %vm118_vm0, %v599_v41 }
 0x4f5   :  { %662 = vmatprep.mubr.bf16.mxu0 %v3319_v0  ;;  %1103 = vmatpush1.bf16.msra.mxu0 %v3404_v6  ;;  %v576_v2 = vpop.permute.xlu1 %575 }
 0x4f6   :  { %1104 = vmatprep.subr.bf16.mxu0 %v3406_v7  ;;  %v586_v3 = vmul.f32 %v2847_v42, %v576_v2 }
 0x4f8   :  { %v600_v45 = vpack.c.bf16 %v586_v3, %v586_v3 }
 0x4f9   :  { %1105 = vmatpush1.bf16.msra.mxu0 %v3412_v8  ;;  %v593_v8 = vld [vmem:[#allocation2 + $0xc8] sm:$0xff] }
 0x4fa   :  { %1586 = vmatprep.subr.bf16.mxu0 %v3388_v1 }
 0x4fc   :  { %2496 = vmatmul.mubr.msk.bf16.gmra.mrb[20].mxu0 %vm118_vm0, %v600_v45 }
 0x4fd   :  { %1130 = vmatprep.mubr.bf16.mxu0 %v3319_v0 }
 0x5bf   :  { %v644_v5 = vpop.f32.mrb[12].mxu0 }
 0x5c0   :  { %v646_v46 = vpop.f32.mrb[13].mxu0  ;;  %v671_v9 = vadd.f32 %v644_v5, %v588_v63 }
 0x5c1   :  { %v3569_v47 = vadd.f32 %v646_v46, %v589_v4  ;;  %v648_v6 = vpop.f32.mrb[14].mxu0 }
 0x5c2   :  { %v650_v49 = vpop.f32.mrb[15].mxu0  ;;  %v2497_v11 = vmul.f32 -1.442695, %v671_v9  ;;  %v673_v13 = vadd.f32 %v648_v6, %v590_v10 }
 0x5c3   :  { %2848 = vtanh.f32 %v3569_v47  ;;  %v3572_v7 = vadd.f32 %v650_v49, %v591_v48 }
 0x5c4   :  { %v2499_v17 = vmul.f32 -1.442695, %v673_v13 }
 0x5c5   :  { %2850 = vtanh.f32 %v3572_v7 }
 0x5c7   :  { %v654_v50 = vpop.f32.mrb[16].mxu0 }
 0x5c8   :  { %v656_v1 = vpop.f32.mrb[17].mxu0  ;;  %v675_v15 = vadd.f32 %v654_v50, %v592_v14 }
 0x5c9   :  { %v3575_v51 = vadd.f32 %v656_v1, %v593_v8  ;;  %v658_v54 = vpop.f32.mrb[18].mxu0 }
 0x5ca   :  { %v660_v16 = vpop.f32.mrb[19].mxu0  ;;  %v2501_v33 = vmul.f32 -1.442695, %v675_v15  ;;  %v677_v18 = vadd.f32 %v658_v54, %v594_v26 }
 0x5cb   :  { %2852 = vtanh.f32 %v3575_v51  ;;  %v3578_v56 = vadd.f32 %v660_v16, %v595_v55  ;;  %v2502_v13 = vmul.f32 -1.442695, %v3575_v51 }
 0x5cc   :  { %v2503_v19 = vmul.f32 -1.442695, %v677_v18 }
 0x5cd   :  { %v2849_v27 = vpop.eup %2848  ;;  %2854 = vtanh.f32 %v3578_v56  ;;  %v2504_v14 = vmul.f32 -1.442695, %v3578_v56 }
 0x5ce   :  { %756 = vrot.lane.b32.xlu0 %v2849_v27, %s3317_s0 }
 0x5cf   :  { %v664_v20 = vpop.f32.mrb[20].mxu0  ;;  %v2851_v59 = vpop.eup %2850 }
 0x5d0   :  { %v666_v30 = vpop.f32.mrb[21].mxu0  ;;  %758 = vrot.lane.b32.xlu1 %v2851_v59, %s3317_s0  ;;  %v679_v21 = vadd.f32 %v664_v20, %v596_v39 }
 0x5d1   :  { %v668_v34 = vpop.f32.mrb[22].mxu0  ;;  %v3583_v38 = vadd.f32 %v666_v30, %v597_v24 }
 0x5d2   :  { %v669_v60 = vpop.f32.mrb[23].mxu0  ;;  %v2505_v25 = vmul.f32 -1.442695, %v679_v21 }
 0x5d3   :  { %2856 = vtanh.f32 %v3583_v38  ;;  %v2506_v26 = vmul.f32 -1.442695, %v3583_v38 }
 0x5d4   :  { %2858 = vpow2.f32 %v2497_v11  ;;  %v2498_v11 = vmul.f32 -1.442695, %v3569_v47 }
 0x5d5   :  { %v2853_v62 = vpop.eup %2852  ;;  %2860 = vpow2.f32 %v2499_v17 }
 0x5d6   :  { %760 = vrot.lane.b32.xlu0 %v2853_v62, %s3317_s0  ;;  %2862 = vpow2.f32 %v2501_v33 }
 0x5d7   :  { %v2855_v32 = vpop.eup %2854  ;;  %2864 = vpow2.f32 %v2503_v19 }
 0x5d8   :  { %762 = vrot.lane.b32.xlu1 %v2855_v32, %s3317_s0 }
 0x5dd   :  { %v2857_v43 = vpop.eup %2856 }
 0x5de   :  { %764 = vrot.lane.b32.xlu0 %v2857_v43, %s3317_s0  ;;  %v2859_v44 = vpop.eup %2858 }
 0x5df   :  { %v711_v22 = vadd.f32 1.0, %v2859_v44  ;;  %v2861_v23 = vpop.eup %2860 }
 0x5e0   :  { %v2863_v28 = vpop.eup %2862  ;;  %v713_v52 = vadd.f32 1.0, %v2861_v23 }
 0x5e1   :  { %2866 = vrcp.f32 %v711_v22  ;;  %v715_v29 = vadd.f32 1.0, %v2863_v28  ;;  %v2865_v31 = vpop.eup %2864 }
 0x5e2   :  { %2868 = vpow2.f32 %v2505_v25  ;;  %v717_v35 = vadd.f32 1.0, %v2865_v31 }
 0x5e3   :  { %2870 = vrcp.f32 %v713_v52 }
 0x5e4   :  { %2872 = vrcp.f32 %v715_v29  ;;  %v3626_v29 = vld [vmem:[#allocation5] ss:$8 sps:$4 sm:$0xff]  }
 0x5e5   :  { %2874 = vrcp.f32 %v717_v35  ;;  %v3629_v35 = vld [vmem:[#allocation5 + $0x14] ss:$8 sps:$4 sm:$0xff]  }
 0x5eb   :  { %v2867_v36 = vpop.eup %2866 }
 0x5ec   :  { %v2869_v41 = vpop.eup %2868  ;;  %v746_v54 = vmul.f32 %v2867_v36, %v3526_v53 }
 0x5ed   :  { %v2871_v42 = vpop.eup %2870  ;;  %v719_v3 = vadd.f32 1.0, %v2869_v41 }
 0x5ee   :  { %v2873_v4 = vpop.eup %2872  ;;  %v747_v27 = vmul.f32 %v2871_v42, %v3530_v12 }
 0x5ef   :  { %2876 = vrcp.f32 %v719_v3  ;;  %v2875_v6 = vpop.eup %2874  ;;  %v748_v30 = vmul.f32 %v2873_v4, %v3534_v57  ;;  %v3635_v3 = vld [vmem:[#allocation5 + $0x24] ss:$8 sps:$4 sm:$0xff]  }
 0x5f0   :  { %v749_v53 = vmul.f32 %v2875_v6, %v3538_v58 }
 0x5f9   :  { %v2877_v8 = vpop.eup %2876 }
 0x5fa   :  { %v750_v57 = vmul.f32 %v2877_v8, %v3544_v61  ;;  %v2500_v61 = vmul.f32 -1.442695, %v3572_v7 }
 0x640   :  { %v757_v37 = vpop.permute.xlu0 %756 }
 0x641   :  { %v771_v40 = vmul.f32 %v2867_v36, %v757_v37 }
 0x642   :  { %v759_v2 = vpop.permute.xlu1 %758 }
 0x643   :  { %781 = vrot.lane.b32.xlu1 %v771_v40, %s3317_s0  ;;  %v772_v45 = vmul.f32 %v2871_v42, %v759_v2  ;;  %v3632_v42 = vld [vmem:[#allocation5 + $0x10] ss:$8 sps:$4 sm:$0xff]  }
 0x645   :  { %783 = vrot.lane.b32.xlu0 %v772_v45, %s3317_s0  ;;  %v3640_v45 = vld [vmem:[#allocation5 + $0x20] ss:$8 sps:$4 sm:$0xff]  }
 0x648   :  { %v761_v5 = vpop.permute.xlu0 %760 }
 0x649   :  { %v773_v46 = vmul.f32 %v2873_v4, %v761_v5 }
 0x64a   :  { %v763_v48 = vpop.permute.xlu1 %762 }
 0x64b   :  { %785 = vrot.lane.b32.xlu1 %v773_v46, %s3317_s0  ;;  %v774_v49 = vmul.f32 %v2875_v6, %v763_v48  ;;  %v3643_v46 = vld [vmem:[#allocation5 + $0x34] ss:$8 sps:$4 sm:$0xff]   ;;  %v3646_v48 = vld [vmem:[#allocation5 + $0x30] ss:$8 sps:$4 sm:$0xff]  }
 0x64d   :  { %787 = vrot.lane.b32.xlu0 %v774_v49, %s3317_s0 }
 0x650   :  { %v765_v50 = vpop.permute.xlu0 %764 }
 0x651   :  { %v775_v1 = vmul.f32 %v2877_v8, %v765_v50  ;;  %v3215_v8 = vld [vmem:[#allocation5 + $0x4] ss:$8 sps:$4 sm:$0xff]   ;;  %v833_v50 = vld [vmem:[#allocation2 + $0xf8] sm:$0xff] }
 0x653   :  { %789 = vrot.lane.b32.xlu1 %v775_v1, %s3317_s0 }
 0x6b5   :  { %v782_v55 = vpop.permute.xlu1 %781 }
 0x6b6   :  { %v3595_v16 = vadd.f32 %v782_v55, %v746_v54 }
 0x6b7   :  { %v784_v20 = vpop.permute.xlu0 %783 }
 0x6b8   :  { %2878 = vtanh.f32 %v3595_v16  ;;  %v3599_v24 = vadd.f32 %v784_v20, %v747_v27  ;;  %v835_v20 = vld [vmem:[#allocation2 + $0x108] sm:$0xff] }
 0x6ba   :  { %2880 = vtanh.f32 %v3599_v24 }
 0x6bd   :  { %v786_v34 = vpop.permute.xlu1 %785 }
 0x6be   :  { %v3603_v59 = vadd.f32 %v786_v34, %v748_v30 }
 0x6bf   :  { %v788_v62 = vpop.permute.xlu0 %787 }
 0x6c0   :  { %2882 = vtanh.f32 %v3603_v59  ;;  %v3607_v32 = vadd.f32 %v788_v62, %v749_v53  ;;  %v837_v53 = vld [vmem:[#allocation2 + $0x118] sm:$0xff] }
 0x6c2   :  { %v2879_v60 = vpop.eup %2878  ;;  %2884 = vtanh.f32 %v3607_v32 }
 0x6c3   :  { %811 = vrot.lane.b32.xlu0 %v2879_v60, %s3317_s0 }
 0x6c4   :  { %v2881_v12 = vpop.eup %2880 }
 0x6c5   :  { %813 = vrot.lane.b32.xlu1 %v2881_v12, %s3317_s0  ;;  %v790_v43 = vpop.permute.xlu1 %789 }
 0x6c6   :  { %v3613_v9 = vadd.f32 %v790_v43, %v750_v57  ;;  %v839_v43 = vld [vmem:[#allocation2 + $0x128] sm:$0xff] }
 0x6c8   :  { %2886 = vtanh.f32 %v3613_v9 }
 0x6c9   :  { %2888 = vpow2.f32 %v2498_v11 }
 0x6ca   :  { %v2883_v63 = vpop.eup %2882  ;;  %2890 = vpow2.f32 %v2500_v61  ;;  %v841_v61 = vld [vmem:[#allocation2 + $0x138] sm:$0xff] }
 0x6cb   :  { %815 = vrot.lane.b32.xlu0 %v2883_v63, %s3317_s0  ;;  %2892 = vpow2.f32 %v2502_v13 }
 0x6cc   :  { %v2885_v58 = vpop.eup %2884  ;;  %2894 = vpow2.f32 %v2504_v14 }
 0x6cd   :  { %817 = vrot.lane.b32.xlu1 %v2885_v58, %s3317_s0  ;;  %2896 = vpow2.f32 %v2506_v26 }
 0x6d2   :  { %v2887_v10 = vpop.eup %2886 }
 0x6d3   :  { %819 = vrot.lane.b32.xlu0 %v2887_v10, %s3317_s0  ;;  %v2889_v15 = vpop.eup %2888 }
 0x6d4   :  { %v2891_v17 = vpop.eup %2890  ;;  %v712_v33 = vadd.f32 1.0, %v2889_v15 }
 0x6d5   :  { %v714_v18 = vadd.f32 1.0, %v2891_v17  ;;  %v2893_v19 = vpop.eup %2892 }
 0x6d6   :  { %2898 = vrcp.f32 %v712_v33  ;;  %v2895_v47 = vpop.eup %2894  ;;  %v716_v7 = vadd.f32 1.0, %v2893_v19 }
 0x6d7   :  { %2900 = vrcp.f32 %v714_v18  ;;  %v718_v39 = vadd.f32 1.0, %v2895_v47  ;;  %v2897_v44 = vpop.eup %2896  ;;  %v832_v47 = vld [vmem:[#allocation2 + $0xf0] sm:$0xff] }
 0x6d8   :  { %2902 = vrcp.f32 %v716_v7  ;;  %v720_v23 = vadd.f32 1.0, %v2897_v44 }
 0x6d9   :  { %2904 = vrcp.f32 %v718_v39  ;;  %v834_v39 = vld [vmem:[#allocation2 + $0x100] sm:$0xff] }
 0x6da   :  { %2906 = vrcp.f32 %v720_v23  ;;  %v838_v23 = vld [vmem:[#allocation2 + $0x120] sm:$0xff] }
 0x6e0   :  { %v2899_v56 = vpop.eup %2898 }
 0x6e1   :  { %v2901_v21 = vpop.eup %2900 }
 0x6e2   :  { %v2903_v31 = vpop.eup %2902 }
 0x6e3   :  { %v2905_v36 = vpop.eup %2904 }
 0x6e4   :  { %v2907_v4 = vpop.eup %2906 }
 0x735   :  { %v812_v51 = vpop.permute.xlu0 %811 }
 0x736   :  { %v826_v25 = vmul.f32 %v2899_v56, %v812_v51  ;;  %v836_v56 = vld [vmem:[#allocation2 + $0x110] sm:$0xff] }
 0x737   :  { %v814_v22 = vpop.permute.xlu1 %813 }
 0x738   :  { %v827_v28 = vmul.f32 %v2901_v21, %v814_v22 }
 0x73a   :  { %v842_v38 = vpack.c.bf16 %v827_v28, %v826_v25 }
 0x73c   :  { %2507 = vmatmul.mubr.msk.bf16.vlgmr.msra.gmra.mrb[12].mxu1 %vm118_vm0, %v842_v38 }
 0x73d   :  { %v816_v52 = vpop.permute.xlu0 %815  ;;  %896 = vmatprep.mubr.bf16.mxu1 %v3319_v0  ;;  %1343 = vmatpush1.bf16.msra.mxu1 %v3626_v29 }
 0x73e   :  { %1344 = vmatprep.subr.bf16.mxu1 %v3629_v35  ;;  %v828_v40 = vmul.f32 %v2903_v31, %v816_v52  ;;  %v840_v52 = vld [vmem:[#allocation2 + $0x130] sm:$0xff] }
 0x73f   :  { %v818_v37 = vpop.permute.xlu1 %817 }
 0x740   :  { %v829_v41 = vmul.f32 %v2905_v36, %v818_v37 }
 0x741   :  { %1345 = vmatpush1.bf16.msra.mxu1 %v3632_v42 }
 0x742   :  { %v843_v2 = vpack.c.bf16 %v829_v41, %v828_v40  ;;  %1346 = vmatprep.subr.bf16.mxu1 %v3635_v3 }
 0x744   :  { %2508 = vmatmul.mubr.msk.bf16.gmra.mrb[16].mxu1 %vm118_vm0, %v843_v2 }
 0x745   :  { %906 = vmatprep.mubr.bf16.mxu1 %v3319_v0  ;;  %1347 = vmatpush1.bf16.msra.mxu1 %v3640_v45  ;;  %v820_v5 = vpop.permute.xlu0 %819 }
 0x746   :  { %1348 = vmatprep.subr.bf16.mxu1 %v3643_v46  ;;  %v830_v6 = vmul.f32 %v2907_v4, %v820_v5 }
 0x748   :  { %v844_v49 = vpack.c.bf16 %v830_v6, %v830_v6 }
 0x749   :  { %1349 = vmatpush1.bf16.msra.mxu1 %v3646_v48 }
 0x74a   :  { %1830 = vmatprep.subr.bf16.mxu1 %v3215_v8 }
 0x74c   :  { %2509 = vmatmul.mubr.msk.bf16.gmra.mrb[20].mxu1 %vm118_vm0, %v844_v49 }
 0x74d   :  { %1374 = vmatprep.mubr.bf16.mxu1 %v3319_v0 }
 0x80f   :  { %v888_v1 = vpop.f32.mrb[12].mxu1 }
 0x810   :  { %v890_v54 = vpop.f32.mrb[13].mxu1  ;;  %v915_v7 = vadd.f32 %v888_v1, %v832_v47 }
 0x811   :  { %v3651_v55 = vadd.f32 %v890_v54, %v833_v50  ;;  %v892_v27 = vpop.f32.mrb[14].mxu1 }
 0x812   :  { %v894_v30 = vpop.f32.mrb[15].mxu1  ;;  %v2510_v44 = vmul.f32 -1.442695, %v915_v7  ;;  %v917_v51 = vadd.f32 %v892_v27, %v834_v39 }
 0x813   :  { %2908 = vtanh.f32 %v3651_v55  ;;  %v3654_v34 = vadd.f32 %v894_v30, %v835_v20 }
 0x814   :  { %v2512_v22 = vmul.f32 -1.442695, %v917_v51 }
 0x815   :  { %2910 = vtanh.f32 %v3654_v34 }
 0x817   :  { %v898_v60 = vpop.f32.mrb[16].mxu1 }
 0x818   :  { %v900_v62 = vpop.f32.mrb[17].mxu1  ;;  %v919_v21 = vadd.f32 %v898_v60, %v836_v56 }
 0x819   :  { %v3657_v12 = vadd.f32 %v900_v62, %v837_v53  ;;  %v902_v57 = vpop.f32.mrb[18].mxu1 }
 0x81a   :  { %v904_v63 = vpop.f32.mrb[19].mxu1  ;;  %v2514_v25 = vmul.f32 -1.442695, %v919_v21  ;;  %v921_v28 = vadd.f32 %v902_v57, %v838_v23 }
 0x81b   :  { %2912 = vtanh.f32 %v3657_v12  ;;  %v3660_v58 = vadd.f32 %v904_v63, %v839_v43 }
 0x81c   :  { %v2516_v38 = vmul.f32 -1.442695, %v921_v28  ;;  %v2511_v28 = vmul.f32 -1.442695, %v3651_v55 }
 0x81d   :  { %v2909_v10 = vpop.eup %2908  ;;  %2914 = vtanh.f32 %v3660_v58 }
 0x81e   :  { %1000 = vrot.lane.b32.xlu1 %v2909_v10, %s3317_s0 }
 0x81f   :  { %v908_v11 = vpop.f32.mrb[20].mxu1  ;;  %v2911_v15 = vpop.eup %2910 }
 0x820   :  { %v910_v13 = vpop.f32.mrb[21].mxu1  ;;  %1002 = vrot.lane.b32.xlu0 %v2911_v15, %s3317_s0  ;;  %v923_v36 = vadd.f32 %v908_v11, %v840_v52  ;;  %v2517_v52 = vmul.f32 -1.442695, %v3660_v58 }
 0x821   :  { %v912_v14 = vpop.f32.mrb[22].mxu1  ;;  %v3665_v26 = vadd.f32 %v910_v13, %v841_v61 }
 0x822   :  { %v913_v17 = vpop.f32.mrb[23].mxu1  ;;  %v2518_v41 = vmul.f32 -1.442695, %v923_v36 }
 0x823   :  { %2916 = vtanh.f32 %v3665_v26 }
 0x824   :  { %2918 = vpow2.f32 %v2510_v44 }
 0x825   :  { %v2913_v33 = vpop.eup %2912  ;;  %2920 = vpow2.f32 %v2512_v22 }
 0x826   :  { %1004 = vrot.lane.b32.xlu1 %v2913_v33, %s3317_s0  ;;  %2922 = vpow2.f32 %v2514_v25 }
 0x827   :  { %v2915_v18 = vpop.eup %2914  ;;  %2924 = vpow2.f32 %v2516_v38  ;;  %v2515_v38 = vmul.f32 -1.442695, %v3657_v12 }
 0x828   :  { %1006 = vrot.lane.b32.xlu0 %v2915_v18, %s3317_s0 }
 0x82d   :  { %v2917_v19 = vpop.eup %2916 }
 0x82e   :  { %1008 = vrot.lane.b32.xlu1 %v2917_v19, %s3317_s0  ;;  %v2919_v31 = vpop.eup %2918 }
 0x82f   :  { %v955_v37 = vadd.f32 1.0, %v2919_v31  ;;  %v2921_v40 = vpop.eup %2920 }
 0x830   :  { %v2923_v2 = vpop.eup %2922  ;;  %v957_v4 = vadd.f32 1.0, %v2921_v40 }
 0x831   :  { %2926 = vrcp.f32 %v955_v37  ;;  %v959_v5 = vadd.f32 1.0, %v2923_v2  ;;  %v2925_v6 = vpop.eup %2924  ;;  %v2519_v37 = vmul.f32 -1.442695, %v3665_v26 }
 0x832   :  { %2928 = vpow2.f32 %v2518_v41  ;;  %v961_v49 = vadd.f32 1.0, %v2925_v6 }
 0x833   :  { %2930 = vrcp.f32 %v957_v4 }
 0x834   :  { %2932 = vrcp.f32 %v959_v5 }
 0x835   :  { %2934 = vrcp.f32 %v961_v49 }
 0x83b   :  { %v2927_v8 = vpop.eup %2926 }
 0x83c   :  { %v2929_v54 = vpop.eup %2928  ;;  %v990_v14 = vmul.f32 %v2927_v8, %v3595_v16 }
 0x83d   :  { %v2931_v27 = vpop.eup %2930  ;;  %v963_v30 = vadd.f32 1.0, %v2929_v54 }
 0x83e   :  { %v2933_v60 = vpop.eup %2932  ;;  %v991_v33 = vmul.f32 %v2931_v27, %v3599_v24 }
 0x83f   :  { %2936 = vrcp.f32 %v963_v30  ;;  %v2935_v43 = vpop.eup %2934  ;;  %v992_v47 = vmul.f32 %v2933_v60, %v3603_v59 }
 0x840   :  { %v993_v16 = vmul.f32 %v2935_v43, %v3607_v32 }
 0x849   :  { %v2937_v11 = vpop.eup %2936 }
 0x84a   :  { %v994_v59 = vmul.f32 %v2937_v11, %v3613_v9  ;;  %v2513_v9 = vmul.f32 -1.442695, %v3654_v34 }
 0x890   :  { %v1001_v50 = vpop.permute.xlu1 %1000 }
 0x891   :  { %v1015_v1 = vmul.f32 %v2927_v8, %v1001_v50 }
 0x892   :  { %v1003_v20 = vpop.permute.xlu0 %1002 }
 0x893   :  { %1025 = vrot.lane.b32.xlu0 %v1015_v1, %s3317_s0  ;;  %v1016_v53 = vmul.f32 %v2931_v27, %v1003_v20 }
 0x895   :  { %1027 = vrot.lane.b32.xlu1 %v1016_v53, %s3317_s0 }
 0x898   :  { %v1005_v62 = vpop.permute.xlu1 %1004 }
 0x899   :  { %v1017_v57 = vmul.f32 %v2933_v60, %v1005_v62 }
 0x89a   :  { %v1007_v63 = vpop.permute.xlu0 %1006 }
 0x89b   :  { %1029 = vrot.lane.b32.xlu0 %v1017_v57, %s3317_s0  ;;  %v1018_v10 = vmul.f32 %v2935_v43, %v1007_v63 }
 0x89d   :  { %1031 = vrot.lane.b32.xlu1 %v1018_v10, %s3317_s0 }
 0x8a0   :  { %v1009_v61 = vpop.permute.xlu1 %1008 }
 0x8a1   :  { %v1019_v13 = vmul.f32 %v2937_v11, %v1009_v61  ;;  %v1077_v11 = vld [vmem:[#allocation2 + $0x148] sm:$0xff] }
 0x8a3   :  { %1033 = vrot.lane.b32.xlu0 %v1019_v13, %s3317_s0 }
 0x905   :  { %v1026_v15 = vpop.permute.xlu0 %1025 }
 0x906   :  { %v3677_v17 = vadd.f32 %v1026_v15, %v990_v14 }
 0x907   :  { %v1028_v18 = vpop.permute.xlu1 %1027 }
 0x908   :  { %2938 = vtanh.f32 %v3677_v17  ;;  %v3681_v19 = vadd.f32 %v1028_v18, %v991_v33  ;;  %v1079_v33 = vld [vmem:[#allocation2 + $0x158] sm:$0xff] }
 0x90a   :  { %2940 = vtanh.f32 %v3681_v19 }
 0x90d   :  { %v1030_v7 = vpop.permute.xlu0 %1029 }
 0x90e   :  { %v3685_v39 = vadd.f32 %v1030_v7, %v992_v47  ;;  %v1081_v7 = vld [vmem:[#allocation2 + $0x168] sm:$0xff] }
 0x90f   :  { %v1032_v51 = vpop.permute.xlu1 %1031 }
 0x910   :  { %2942 = vtanh.f32 %v3685_v39  ;;  %v3689_v56 = vadd.f32 %v1032_v51, %v993_v16 }
 0x912   :  { %v2939_v44 = vpop.eup %2938  ;;  %2944 = vtanh.f32 %v3689_v56 }
 0x913   :  { %1055 = vrot.lane.b32.xlu1 %v2939_v44, %s3317_s0 }
 0x914   :  { %v2941_v24 = vpop.eup %2940 }
 0x915   :  { %1057 = vrot.lane.b32.xlu0 %v2941_v24, %s3317_s0  ;;  %v1034_v21 = vpop.permute.xlu0 %1033 }
 0x916   :  { %v3695_v23 = vadd.f32 %v1034_v21, %v994_v59  ;;  %v1083_v59 = vld [vmem:[#allocation2 + $0x178] sm:$0xff] }
 0x918   :  { %2946 = vtanh.f32 %v3695_v23 }
 0x919   :  { %2948 = vpow2.f32 %v2511_v28  ;;  %v1085_v28 = vld [vmem:[#allocation2 + $0x188] sm:$0xff] }
 0x91a   :  { %v2943_v22 = vpop.eup %2942  ;;  %2950 = vpow2.f32 %v2513_v9 }
 0x91b   :  { %1059 = vrot.lane.b32.xlu1 %v2943_v22, %s3317_s0  ;;  %2952 = vpow2.f32 %v2515_v38 }
 0x91c   :  { %v2945_v32 = vpop.eup %2944  ;;  %2954 = vpow2.f32 %v2517_v52 }
 0x91d   :  { %1061 = vrot.lane.b32.xlu0 %v2945_v32, %s3317_s0  ;;  %2956 = vpow2.f32 %v2519_v37 }
 0x922   :  { %v2947_v25 = vpop.eup %2946 }
 0x923   :  { %1063 = vrot.lane.b32.xlu1 %v2947_v25, %s3317_s0  ;;  %v2949_v31 = vpop.eup %2948 }
 0x924   :  { %v2951_v36 = vpop.eup %2950  ;;  %v956_v40 = vadd.f32 1.0, %v2949_v31 }
 0x925   :  { %v958_v41 = vadd.f32 1.0, %v2951_v36  ;;  %v2953_v2 = vpop.eup %2952 }
 0x926   :  { %2958 = vrcp.f32 %v956_v40  ;;  %v2955_v55 = vpop.eup %2954  ;;  %v960_v34 = vadd.f32 1.0, %v2953_v2  ;;  %v1076_v2 = vld [vmem:[#allocation2 + $0x140] sm:$0xff] }
 0x927   :  { %2960 = vrcp.f32 %v958_v41  ;;  %v962_v4 = vadd.f32 1.0, %v2955_v55  ;;  %v2957_v5 = vpop.eup %2956 }
 0x928   :  { %2962 = vrcp.f32 %v960_v34  ;;  %v964_v8 = vadd.f32 1.0, %v2957_v5  ;;  %v1078_v34 = vld [vmem:[#allocation2 + $0x150] sm:$0xff] }
 0x929   :  { %2964 = vrcp.f32 %v962_v4 }
 0x92a   :  { %2966 = vrcp.f32 %v964_v8 }
 0x930   :  { %v2959_v58 = vpop.eup %2958 }
 0x931   :  { %v2961_v6 = vpop.eup %2960 }
 0x932   :  { %v2963_v27 = vpop.eup %2962 }
 0x933   :  { %v2965_v20 = vpop.eup %2964 }
 0x934   :  { %v2967_v57 = vpop.eup %2966 }
 0x985   :  { %v1056_v12 = vpop.permute.xlu1 %1055 }
 0x986   :  { %v1070_v50 = vmul.f32 %v2959_v58, %v1056_v12  ;;  %v1080_v12 = vld [vmem:[#allocation2 + $0x160] sm:$0xff] }
 0x987   :  { %v1058_v49 = vpop.permute.xlu0 %1057 }
 0x988   :  { %v1071_v1 = vmul.f32 %v2961_v6, %v1058_v49  ;;  %v1082_v49 = vld [vmem:[#allocation2 + $0x170] sm:$0xff] }
 0x98a   :  { %v1086_v26 = vpack.c.bf16 %v1071_v1, %v1070_v50 }
 0x98c   :  { %2520 = vmatmul.mubr.msk.bf16.vlgmr.msra.gmra.mrb[24].mxu0 %vm118_vm0, %v1086_v26  ;;  %v1084_v26 = vld [vmem:[#allocation2 + $0x180] sm:$0xff] }
 0x98d   :  { %v1060_v54 = vpop.permute.xlu1 %1059  ;;  %1140 = vmatprep.mubr.bf16.mxu0 %v3319_v0  ;;  %1587 = vmatpush1.bf16.msra.mxu0 %v3626_v29 }
 0x98e   :  { %1588 = vmatprep.subr.bf16.mxu0 %v3629_v35  ;;  %v1072_v53 = vmul.f32 %v2963_v27, %v1060_v54 }
 0x98f   :  { %v1062_v30 = vpop.permute.xlu0 %1061 }
 0x990   :  { %v1073_v60 = vmul.f32 %v2965_v20, %v1062_v30 }
 0x991   :  { %1589 = vmatpush1.bf16.msra.mxu0 %v3632_v42 }
 0x992   :  { %v1087_v62 = vpack.c.bf16 %v1073_v60, %v1072_v53  ;;  %1590 = vmatprep.subr.bf16.mxu0 %v3635_v3 }
 0x994   :  { %2521 = vmatmul.mubr.msk.bf16.gmra.mrb[28].mxu0 %vm118_vm0, %v1087_v62 }
 0x995   :  { %1150 = vmatprep.mubr.bf16.mxu0 %v3319_v0  ;;  %1591 = vmatpush1.bf16.msra.mxu0 %v3640_v45  ;;  %v1064_v43 = vpop.permute.xlu1 %1063 }
 0x996   :  { %1592 = vmatprep.subr.bf16.mxu0 %v3643_v46  ;;  %v1074_v63 = vmul.f32 %v2967_v57, %v1064_v43 }
 0x998   :  { %v1088_v10 = vpack.c.bf16 %v1074_v63, %v1074_v63 }
 0x999   :  { %1593 = vmatpush1.bf16.msra.mxu0 %v3646_v48 }
 0x99c   :  { %2522 = vmatmul.mubr.msk.bf16.gmra.mrb[32].mxu0 %vm118_vm0, %v1088_v10 }
 0x99d   :  { %1618 = vmatprep.mubr.bf16.mxu0 %v3319_v0 }
 0xa5f   :  { %v1132_v61 = vpop.f32.mrb[24].mxu0 }
 0xa60   :  { %v1134_v13 = vpop.f32.mrb[25].mxu0  ;;  %v1159_v55 = vadd.f32 %v1132_v61, %v1076_v2 }
 0xa61   :  { %v3719_v14 = vadd.f32 %v1134_v13, %v1077_v11  ;;  %v1136_v15 = vpop.f32.mrb[26].mxu0 }
 0xa62   :  { %v1138_v18 = vpop.f32.mrb[27].mxu0  ;;  %v2523_v4 = vmul.f32 -1.442695, %v1159_v55  ;;  %v1161_v5 = vadd.f32 %v1136_v15, %v1078_v34 }
 0xa63   :  { %2968 = vtanh.f32 %v3719_v14  ;;  %v3722_v47 = vadd.f32 %v1138_v18, %v1079_v33 }
 0xa64   :  { %v2525_v6 = vmul.f32 -1.442695, %v1161_v5 }
 0xa65   :  { %2970 = vtanh.f32 %v3722_v47 }
 0xa67   :  { %v1142_v16 = vpop.f32.mrb[28].mxu0 }
 0xa68   :  { %v1144_v44 = vpop.f32.mrb[29].mxu0  ;;  %v1163_v58 = vadd.f32 %v1142_v16, %v1080_v12 }
 0xa69   :  { %v3725_v51 = vadd.f32 %v1144_v44, %v1081_v7  ;;  %v1146_v24 = vpop.f32.mrb[30].mxu0 }
 0xa6a   :  { %v1148_v21 = vpop.f32.mrb[31].mxu0  ;;  %v2527_v8 = vmul.f32 -1.442695, %v1163_v58  ;;  %v1165_v50 = vadd.f32 %v1146_v24, %v1082_v49 }
 0xa6b   :  { %2972 = vtanh.f32 %v3725_v51  ;;  %v3728_v22 = vadd.f32 %v1148_v21, %v1083_v59 }
 0xa6c   :  { %v2529_v1 = vmul.f32 -1.442695, %v1165_v50  ;;  %v2524_v50 = vmul.f32 -1.442695, %v3719_v14 }
 0xa6d   :  { %v2969_v32 = vpop.eup %2968  ;;  %2974 = vtanh.f32 %v3728_v22 }
 0xa6e   :  { %1244 = vrot.lane.b32.xlu0 %v2969_v32, %s3317_s0 }
 0xa6f   :  { %v1152_v25 = vpop.f32.mrb[32].mxu0  ;;  %v2971_v52 = vpop.eup %2970 }
 0xa70   :  { %v1154_v9 = vpop.f32.mrb[33].mxu0  ;;  %1246 = vrot.lane.b32.xlu1 %v2971_v52, %s3317_s0  ;;  %v1167_v27 = vadd.f32 %v1152_v25, %v1084_v26  ;;  %v2530_v26 = vmul.f32 -1.442695, %v3728_v22 }
 0xa71   :  { %v1156_v38 = vpop.f32.mrb[34].mxu0  ;;  %v3733_v36 = vadd.f32 %v1154_v9, %v1085_v28 }
 0xa72   :  { %v1157_v31 = vpop.f32.mrb[35].mxu0  ;;  %v2531_v53 = vmul.f32 -1.442695, %v1167_v27 }
 0xa73   :  { %2976 = vtanh.f32 %v3733_v36 }
 0xa74   :  { %2978 = vpow2.f32 %v2523_v4 }
 0xa75   :  { %v2973_v37 = vpop.eup %2972  ;;  %2980 = vpow2.f32 %v2525_v6 }
 0xa76   :  { %1248 = vrot.lane.b32.xlu0 %v2973_v37, %s3317_s0  ;;  %2982 = vpow2.f32 %v2527_v8 }
 0xa77   :  { %v2975_v40 = vpop.eup %2974  ;;  %2984 = vpow2.f32 %v2529_v1  ;;  %v2528_v1 = vmul.f32 -1.442695, %v3725_v51 }
 0xa78   :  { %1250 = vrot.lane.b32.xlu1 %v2975_v40, %s3317_s0 }
 0xa7d   :  { %v2977_v41 = vpop.eup %2976 }
 0xa7e   :  { %1252 = vrot.lane.b32.xlu0 %v2977_v41, %s3317_s0  ;;  %v2979_v54 = vpop.eup %2978 }
 0xa7f   :  { %v1199_v20 = vadd.f32 1.0, %v2979_v54  ;;  %v2981_v30 = vpop.eup %2980 }
 0xa80   :  { %v2983_v60 = vpop.eup %2982  ;;  %v1201_v62 = vadd.f32 1.0, %v2981_v30 }
 0xa81   :  { %2986 = vrcp.f32 %v1199_v20  ;;  %v1203_v57 = vadd.f32 1.0, %v2983_v60  ;;  %v2985_v43 = vpop.eup %2984  ;;  %v2532_v20 = vmul.f32 -1.442695, %v3733_v36 }
 0xa82   :  { %2988 = vpow2.f32 %v2531_v53  ;;  %v1205_v63 = vadd.f32 1.0, %v2985_v43 }
 0xa83   :  { %2990 = vrcp.f32 %v1201_v62 }
 0xa84   :  { %2992 = vrcp.f32 %v1203_v57 }
 0xa85   :  { %2994 = vrcp.f32 %v1205_v63 }
 0xa8b   :  { %v2987_v10 = vpop.eup %2986 }
 0xa8c   :  { %v2989_v13 = vpop.eup %2988  ;;  %v1234_v38 = vmul.f32 %v2987_v10, %v3677_v17 }
 0xa8d   :  { %v2991_v15 = vpop.eup %2990  ;;  %v1207_v18 = vadd.f32 1.0, %v2989_v13 }
 0xa8e   :  { %v2993_v16 = vpop.eup %2992  ;;  %v1235_v37 = vmul.f32 %v2991_v15, %v3681_v19 }
 0xa8f   :  { %2996 = vrcp.f32 %v1207_v18  ;;  %v2995_v59 = vpop.eup %2994  ;;  %v1236_v2 = vmul.f32 %v2993_v16, %v3685_v39 }
 0xa90   :  { %v1237_v17 = vmul.f32 %v2995_v59, %v3689_v56 }
 0xa99   :  { %v2997_v25 = vpop.eup %2996 }
 0xa9a   :  { %v1238_v39 = vmul.f32 %v2997_v25, %v3695_v23  ;;  %v2526_v23 = vmul.f32 -1.442695, %v3722_v47 }
 0xae0   :  { %v1245_v11 = vpop.permute.xlu0 %1244 }
 0xae1   :  { %v1259_v61 = vmul.f32 %v2987_v10, %v1245_v11 }
 0xae2   :  { %v1247_v33 = vpop.permute.xlu1 %1246 }
 0xae3   :  { %1269 = vrot.lane.b32.xlu1 %v1259_v61, %s3317_s0  ;;  %v1260_v7 = vmul.f32 %v2991_v15, %v1247_v33 }
 0xae5   :  { %1271 = vrot.lane.b32.xlu0 %v1260_v7, %s3317_s0 }
 0xae8   :  { %v1249_v44 = vpop.permute.xlu0 %1248 }
 0xae9   :  { %v1261_v24 = vmul.f32 %v2993_v16, %v1249_v44 }
 0xaea   :  { %v1251_v21 = vpop.permute.xlu1 %1250 }
 0xaeb   :  { %1273 = vrot.lane.b32.xlu1 %v1261_v24, %s3317_s0  ;;  %v1262_v32 = vmul.f32 %v2995_v59, %v1251_v21 }
 0xaed   :  { %1275 = vrot.lane.b32.xlu0 %v1262_v32, %s3317_s0 }
 0xaf0   :  { %v1253_v28 = vpop.permute.xlu0 %1252 }
 0xaf1   :  { %v1263_v9 = vmul.f32 %v2997_v25, %v1253_v28  ;;  %v1323_v28 = vld [vmem:[#allocation2 + $0x1a8] sm:$0xff] }
 0xaf3   :  { %1277 = vrot.lane.b32.xlu1 %v1263_v9, %s3317_s0 }
 0xb55   :  { %v1270_v52 = vpop.permute.xlu1 %1269 }
 0xb56   :  { %v3745_v31 = vadd.f32 %v1270_v52, %v1234_v38 }
 0xb57   :  { %v1272_v40 = vpop.permute.xlu0 %1271 }
 0xb58   :  { %2998 = vtanh.f32 %v3745_v31  ;;  %v3749_v41 = vadd.f32 %v1272_v40, %v1235_v37  ;;  %v1327_v40 = vld [vmem:[#allocation2 + $0x1c8] sm:$0xff] }
 0xb5a   :  { %3000 = vtanh.f32 %v3749_v41 }
 0xb5d   :  { %v1274_v55 = vpop.permute.xlu1 %1273 }
 0xb5e   :  { %v3753_v34 = vadd.f32 %v1274_v55, %v1236_v2 }
 0xb5f   :  { %v1276_v5 = vpop.permute.xlu0 %1275 }
 0xb60   :  { %3002 = vtanh.f32 %v3753_v34  ;;  %v3757_v12 = vadd.f32 %v1276_v5, %v1237_v17  ;;  %v1329_v5 = vld [vmem:[#allocation2 + $0x1d8] sm:$0xff] }
 0xb62   :  { %v2999_v4 = vpop.eup %2998  ;;  %3004 = vtanh.f32 %v3757_v12 }
 0xb63   :  { %1299 = vrot.lane.b32.xlu0 %v2999_v4, %s3317_s0 }
 0xb64   :  { %v3001_v19 = vpop.eup %3000 }
 0xb65   :  { %1301 = vrot.lane.b32.xlu1 %v3001_v19, %s3317_s0  ;;  %v1278_v58 = vpop.permute.xlu1 %1277 }
 0xb66   :  { %v3763_v49 = vadd.f32 %v1278_v58, %v1238_v39 }
 0xb68   :  { %3006 = vtanh.f32 %v3763_v49 }
 0xb69   :  { %3008 = vpow2.f32 %v2524_v50 }
 0xb6a   :  { %v3003_v6 = vpop.eup %3002  ;;  %3010 = vpow2.f32 %v2526_v23 }
 0xb6b   :  { %1303 = vrot.lane.b32.xlu0 %v3003_v6, %s3317_s0  ;;  %3012 = vpow2.f32 %v2528_v1  ;;  %v1320_v1 = vld [vmem:[#allocation2 + $0x190] sm:$0xff] }
 0xb6c   :  { %v3005_v56 = vpop.eup %3004  ;;  %3014 = vpow2.f32 %v2530_v26 }
 0xb6d   :  { %1305 = vrot.lane.b32.xlu1 %v3005_v56, %s3317_s0  ;;  %3016 = vpow2.f32 %v2532_v20 }
 0xb72   :  { %v3007_v8 = vpop.eup %3006 }
 0xb73   :  { %1307 = vrot.lane.b32.xlu0 %v3007_v8, %s3317_s0  ;;  %v3009_v54 = vpop.eup %3008 }
 0xb74   :  { %v3011_v27 = vpop.eup %3010  ;;  %v1200_v30 = vadd.f32 1.0, %v3009_v54  ;;  %v1322_v54 = vld [vmem:[#allocation2 + $0x1a0] sm:$0xff] }
 0xb75   :  { %v1202_v53 = vadd.f32 1.0, %v3011_v27  ;;  %v3013_v60 = vpop.eup %3012 }
 0xb76   :  { %3018 = vrcp.f32 %v1200_v30  ;;  %v3015_v14 = vpop.eup %3014  ;;  %v1204_v47 = vadd.f32 1.0, %v3013_v60  ;;  %v1324_v30 = vld [vmem:[#allocation2 + $0x1b0] sm:$0xff] }
 0xb77   :  { %3020 = vrcp.f32 %v1202_v53  ;;  %v1206_v62 = vadd.f32 1.0, %v3015_v14  ;;  %v3017_v57 = vpop.eup %3016  ;;  %v1326_v14 = vld [vmem:[#allocation2 + $0x1c0] sm:$0xff] }
 0xb78   :  { %3022 = vrcp.f32 %v1204_v47  ;;  %v1208_v10 = vadd.f32 1.0, %v3017_v57 }
 0xb79   :  { %3024 = vrcp.f32 %v1206_v62 }
 0xb7a   :  { %3026 = vrcp.f32 %v1208_v10 }
 0xb80   :  { %v3019_v22 = vpop.eup %3018 }
 0xb81   :  { %v3021_v43 = vpop.eup %3020 }
 0xb82   :  { %v3023_v15 = vpop.eup %3022 }
 0xb83   :  { %v3025_v33 = vpop.eup %3024 }
 0xb84   :  { %v3027_v24 = vpop.eup %3026 }
 0xbd5   :  { %v1300_v51 = vpop.permute.xlu0 %1299 }
 0xbd6   :  { %v1314_v11 = vmul.f32 %v3019_v22, %v1300_v51  ;;  %v1328_v51 = vld [vmem:[#allocation2 + $0x1d0] sm:$0xff] }
 0xbd7   :  { %v1302_v63 = vpop.permute.xlu1 %1301 }
 0xbd8   :  { %v1315_v61 = vmul.f32 %v3021_v43, %v1302_v63 }
 0xbda   :  { %v1330_v36 = vpack.c.bf16 %v1315_v61, %v1314_v11 }
 0xbdc   :  { %2533 = vmatmul.mubr.msk.bf16.vlgmr.msra.gmra.mrb[24].mxu1 %vm118_vm0, %v1330_v36 }
 0xbdd   :  { %v1304_v13 = vpop.permute.xlu0 %1303  ;;  %1384 = vmatprep.mubr.bf16.mxu1 %v3319_v0  ;;  %1831 = vmatpush1.bf16.msra.mxu1 %v3626_v29 }
 0xbde   :  { %1832 = vmatprep.subr.bf16.mxu1 %v3629_v35  ;;  %v1316_v7 = vmul.f32 %v3023_v15, %v1304_v13 }
 0xbdf   :  { %v1306_v18 = vpop.permute.xlu1 %1305 }
 0xbe0   :  { %v1317_v16 = vmul.f32 %v3025_v33, %v1306_v18 }
 0xbe1   :  { %1833 = vmatpush1.bf16.msra.mxu1 %v3632_v42  ;;  %v1321_v42 = vld [vmem:[#allocation2 + $0x198] sm:$0xff] }
 0xbe2   :  { %v1331_v44 = vpack.c.bf16 %v1317_v16, %v1316_v7  ;;  %1834 = vmatprep.subr.bf16.mxu1 %v3635_v3 }
 0xbe4   :  { %2534 = vmatmul.mubr.msk.bf16.gmra.mrb[28].mxu1 %vm118_vm0, %v1331_v44 }
 0xbe5   :  { %1394 = vmatprep.mubr.bf16.mxu1 %v3319_v0  ;;  %1835 = vmatpush1.bf16.msra.mxu1 %v3640_v45  ;;  %v1308_v29 = vpop.permute.xlu0 %1307 }
 0xbe6   :  { %1836 = vmatprep.subr.bf16.mxu1 %v3643_v46  ;;  %v1318_v35 = vmul.f32 %v3027_v24, %v1308_v29  ;;  %v1325_v46 = vld [vmem:[#allocation2 + $0x1b8] sm:$0xff] }
 0xbe8   :  { %v1332_v59 = vpack.c.bf16 %v1318_v35, %v1318_v35 }
 0xbe9   :  { %1837 = vmatpush1.bf16.msra.mxu1 %v3646_v48 }
 0xbec   :  { %2535 = vmatmul.mubr.msk.bf16.gmra.mrb[32].mxu1 %vm118_vm0, %v1332_v59 }
 0xbed   :  { %1862 = vmatprep.mubr.bf16.mxu1 %v3319_v0 }
 0xcaf   :  { %v1376_v3 = vpop.f32.mrb[24].mxu1 }
 0xcb0   :  { %v1378_v21 = vpop.f32.mrb[25].mxu1  ;;  %v1403_v26 = vadd.f32 %v1376_v3, %v1320_v1 }
 0xcb1   :  { %v3787_v32 = vadd.f32 %v1378_v21, %v1321_v42  ;;  %v1380_v25 = vpop.f32.mrb[26].mxu1 }
 0xcb2   :  { %v1382_v45 = vpop.f32.mrb[27].mxu1  ;;  %v2536_v27 = vmul.f32 -1.442695, %v1403_v26  ;;  %v1405_v20 = vadd.f32 %v1380_v25, %v1322_v54 }
 0xcb3   :  { %3028 = vtanh.f32 %v3787_v32  ;;  %v3790_v9 = vadd.f32 %v1382_v45, %v1323_v28 }
 0xcb4   :  { %v2538_v60 = vmul.f32 -1.442695, %v1405_v20 }
 0xcb5   :  { %3030 = vtanh.f32 %v3790_v9 }
 0xcb7   :  { %v1386_v38 = vpop.f32.mrb[28].mxu1 }
 0xcb8   :  { %v1388_v48 = vpop.f32.mrb[29].mxu1  ;;  %v1407_v53 = vadd.f32 %v1386_v38, %v1324_v30 }
 0xcb9   :  { %v3793_v52 = vadd.f32 %v1388_v48, %v1325_v46  ;;  %v1390_v37 = vpop.f32.mrb[30].mxu1 }
 0xcba   :  { %v1392_v2 = vpop.f32.mrb[31].mxu1  ;;  %v2540_v47 = vmul.f32 -1.442695, %v1407_v53  ;;  %v1409_v62 = vadd.f32 %v1390_v37, %v1326_v14 }
 0xcbb   :  { %3032 = vtanh.f32 %v3793_v52  ;;  %v3796_v55 = vadd.f32 %v1392_v2, %v1327_v40  ;;  %v2541_v20 = vmul.f32 -1.442695, %v3793_v52 }
 0xcbc   :  { %v2542_v57 = vmul.f32 -1.442695, %v1409_v62 }
 0xcbd   :  { %v3029_v17 = vpop.eup %3028  ;;  %3034 = vtanh.f32 %v3796_v55  ;;  %v2543_v30 = vmul.f32 -1.442695, %v3796_v55 }
 0xcbe   :  { %1488 = vrot.lane.b32.xlu1 %v3029_v17, %s3317_s0 }
 0xcbf   :  { %v1396_v4 = vpop.f32.mrb[32].mxu1  ;;  %v3031_v58 = vpop.eup %3030 }
 0xcc0   :  { %v1398_v19 = vpop.f32.mrb[33].mxu1  ;;  %1490 = vrot.lane.b32.xlu0 %v3031_v58, %s3317_s0  ;;  %v1411_v43 = vadd.f32 %v1396_v4, %v1328_v51 }
 0xcc1   :  { %v1400_v39 = vpop.f32.mrb[34].mxu1  ;;  %v3801_v56 = vadd.f32 %v1398_v19, %v1329_v5 }
 0xcc2   :  { %v1401_v6 = vpop.f32.mrb[35].mxu1  ;;  %v2544_v11 = vmul.f32 -1.442695, %v1411_v43 }
 0xcc3   :  { %3036 = vtanh.f32 %v3801_v56  ;;  %v2545_v14 = vmul.f32 -1.442695, %v3801_v56 }
 0xcc4   :  { %3038 = vpow2.f32 %v2536_v27  ;;  %v2537_v27 = vmul.f32 -1.442695, %v3787_v32 }
 0xcc5   :  { %v3033_v8 = vpop.eup %3032  ;;  %3040 = vpow2.f32 %v2538_v60 }
 0xcc6   :  { %1492 = vrot.lane.b32.xlu1 %v3033_v8, %s3317_s0  ;;  %3042 = vpow2.f32 %v2540_v47 }
 0xcc7   :  { %v3035_v50 = vpop.eup %3034  ;;  %3044 = vpow2.f32 %v2542_v57 }
 0xcc8   :  { %1494 = vrot.lane.b32.xlu0 %v3035_v50, %s3317_s0 }
 0xccd   :  { %v3037_v23 = vpop.eup %3036 }
 0xcce   :  { %1496 = vrot.lane.b32.xlu1 %v3037_v23, %s3317_s0  ;;  %v3039_v22 = vpop.eup %3038 }
 0xccf   :  { %v1443_v63 = vadd.f32 1.0, %v3039_v22  ;;  %v3041_v10 = vpop.eup %3040 }
 0xcd0   :  { %v3043_v61 = vpop.eup %3042  ;;  %v1445_v36 = vadd.f32 1.0, %v3041_v10 }
 0xcd1   :  { %3046 = vrcp.f32 %v1443_v63  ;;  %v1447_v13 = vadd.f32 1.0, %v3043_v61  ;;  %v3045_v15 = vpop.eup %3044 }
 0xcd2   :  { %3048 = vpow2.f32 %v2544_v11  ;;  %v1449_v33 = vadd.f32 1.0, %v3045_v15 }
 0xcd3   :  { %3050 = vrcp.f32 %v1445_v36 }
 0xcd4   :  { %3052 = vrcp.f32 %v1447_v13 }
 0xcd5   :  { %3054 = vrcp.f32 %v1449_v33 }
 0xcdb   :  { %v3047_v18 = vpop.eup %3046 }
 0xcdc   :  { %v3049_v44 = vpop.eup %3048  ;;  %v1478_v37 = vmul.f32 %v3047_v18, %v3745_v31 }
 0xcdd   :  { %v3051_v24 = vpop.eup %3050  ;;  %v1451_v35 = vadd.f32 1.0, %v3049_v44 }
 0xcde   :  { %v3053_v42 = vpop.eup %3052  ;;  %v1479_v17 = vmul.f32 %v3051_v24, %v3749_v41 }
 0xcdf   :  { %3056 = vrcp.f32 %v1451_v35  ;;  %v3055_v25 = vpop.eup %3054  ;;  %v1480_v19 = vmul.f32 %v3053_v42, %v3753_v34 }
 0xce0   :  { %v1481_v31 = vmul.f32 %v3055_v25, %v3757_v12 }
 0xce9   :  { %v3057_v46 = vpop.eup %3056 }
 0xcea   :  { %v1482_v34 = vmul.f32 %v3057_v46, %v3763_v49  ;;  %v2539_v49 = vmul.f32 -1.442695, %v3790_v9 }
 0xd30   :  { %v1489_v7 = vpop.permute.xlu1 %1488 }
 0xd31   :  { %v1503_v16 = vmul.f32 %v3047_v18, %v1489_v7 }
 0xd32   :  { %v1491_v29 = vpop.permute.xlu0 %1490 }
 0xd33   :  { %1513 = vrot.lane.b32.xlu0 %v1503_v16, %s3317_s0  ;;  %v1504_v59 = vmul.f32 %v3051_v24, %v1491_v29 }
 0xd35   :  { %1515 = vrot.lane.b32.xlu1 %v1504_v59, %s3317_s0  ;;  %v1565_v59 = vld [vmem:[#allocation2 + $0x1e8] sm:$0xff] }
 0xd38   :  { %v1493_v3 = vpop.permute.xlu1 %1492 }
 0xd39   :  { %v1505_v21 = vmul.f32 %v3053_v42, %v1493_v3 }
 0xd3a   :  { %v1495_v28 = vpop.permute.xlu0 %1494 }
 0xd3b   :  { %1517 = vrot.lane.b32.xlu0 %v1505_v21, %s3317_s0  ;;  %v1506_v45 = vmul.f32 %v3055_v25, %v1495_v28  ;;  %v1567_v28 = vld [vmem:[#allocation2 + $0x1f8] sm:$0xff] }
 0xd3d   :  { %1519 = vrot.lane.b32.xlu1 %v1506_v45, %s3317_s0 }
 0xd40   :  { %v1497_v38 = vpop.permute.xlu1 %1496 }
 0xd41   :  { %v1507_v48 = vmul.f32 %v3057_v46, %v1497_v38  ;;  %v1569_v38 = vld [vmem:[#allocation2 + $0x208] sm:$0xff] }
 0xd43   :  { %1521 = vrot.lane.b32.xlu0 %v1507_v48, %s3317_s0 }
 0xda5   :  { %v1514_v40 = vpop.permute.xlu0 %1513 }
 0xda6   :  { %v3813_v2 = vadd.f32 %v1514_v40, %v1478_v37 }
 0xda7   :  { %v1516_v4 = vpop.permute.xlu1 %1515 }
 0xda8   :  { %3058 = vtanh.f32 %v3813_v2  ;;  %v3817_v5 = vadd.f32 %v1516_v4, %v1479_v17  ;;  %v1571_v4 = vld [vmem:[#allocation2 + $0x218] sm:$0xff] }
 0xdaa   :  { %3060 = vtanh.f32 %v3817_v5 }
 0xdad   :  { %v1518_v39 = vpop.permute.xlu0 %1517 }
 0xdae   :  { %v3821_v58 = vadd.f32 %v1518_v39, %v1480_v19 }
 0xdaf   :  { %v1520_v8 = vpop.permute.xlu1 %1519 }
 0xdb0   :  { %3062 = vtanh.f32 %v3821_v58  ;;  %v3825_v50 = vadd.f32 %v1520_v8, %v1481_v31  ;;  %v1573_v8 = vld [vmem:[#allocation2 + $0x228] sm:$0xff] }
 0xdb2   :  { %v3059_v6 = vpop.eup %3058  ;;  %3064 = vtanh.f32 %v3825_v50 }
 0xdb3   :  { %1543 = vrot.lane.b32.xlu1 %v3059_v6, %s3317_s0 }
 0xdb4   :  { %v3061_v41 = vpop.eup %3060 }
 0xdb5   :  { %1545 = vrot.lane.b32.xlu0 %v3061_v41, %s3317_s0  ;;  %v1522_v23 = vpop.permute.xlu0 %1521 }
 0xdb6   :  { %v3831_v26 = vadd.f32 %v1522_v23, %v1482_v34 }
 0xdb8   :  { %3066 = vtanh.f32 %v3831_v26 }
 0xdb9   :  { %3068 = vpow2.f32 %v2537_v27 }
 0xdba   :  { %v3063_v1 = vpop.eup %3062  ;;  %3070 = vpow2.f32 %v2539_v49 }
 0xdbb   :  { %1547 = vrot.lane.b32.xlu1 %v3063_v1, %s3317_s0  ;;  %3072 = vpow2.f32 %v2541_v20  ;;  %v1564_v20 = vld [vmem:[#allocation2 + $0x1e0] sm:$0xff] }
 0xdbc   :  { %v3065_v12 = vpop.eup %3064  ;;  %3074 = vpow2.f32 %v2543_v30 }
 0xdbd   :  { %1549 = vrot.lane.b32.xlu0 %v3065_v12, %s3317_s0  ;;  %3076 = vpow2.f32 %v2545_v14 }
 0xdc2   :  { %v3067_v54 = vpop.eup %3066 }
 0xdc3   :  { %1551 = vrot.lane.b32.xlu1 %v3067_v54, %s3317_s0  ;;  %v3069_v53 = vpop.eup %3068 }
 0xdc4   :  { %v3071_v60 = vpop.eup %3070  ;;  %v1444_v47 = vadd.f32 1.0, %v3069_v53  ;;  %v1566_v53 = vld [vmem:[#allocation2 + $0x1f0] sm:$0xff] }
 0xdc5   :  { %v1446_v62 = vadd.f32 1.0, %v3071_v60  ;;  %v3073_v57 = vpop.eup %3072 }
 0xdc6   :  { %3078 = vrcp.f32 %v1444_v47  ;;  %v3075_v32 = vpop.eup %3074  ;;  %v1448_v9 = vadd.f32 1.0, %v3073_v57  ;;  %v1568_v47 = vld [vmem:[#allocation2 + $0x200] sm:$0xff] }
 0xdc7   :  { %3080 = vrcp.f32 %v1446_v62  ;;  %v1450_v51 = vadd.f32 1.0, %v3075_v32  ;;  %v3077_v22 = vpop.eup %3076  ;;  %v1570_v32 = vld [vmem:[#allocation2 + $0x210] sm:$0xff] }
 0xdc8   :  { %3082 = vrcp.f32 %v1448_v9  ;;  %v1452_v10 = vadd.f32 1.0, %v3077_v22 }
 0xdc9   :  { %3084 = vrcp.f32 %v1450_v51 }
 0xdca   :  { %3086 = vrcp.f32 %v1452_v10 }
 0xdd0   :  { %v3079_v55 = vpop.eup %3078 }
 0xdd1   :  { %v3081_v43 = vpop.eup %3080 }
 0xdd2   :  { %v3083_v13 = vpop.eup %3082 }
 0xdd3   :  { %v3085_v15 = vpop.eup %3084 }
 0xdd4   :  { %v3087_v44 = vpop.eup %3086 }
 0xe25   :  { %v1544_v52 = vpop.permute.xlu1 %1543 }
 0xe26   :  { %v1558_v11 = vmul.f32 %v3079_v55, %v1544_v52  ;;  %v1572_v52 = vld [vmem:[#allocation2 + $0x220] sm:$0xff] }
 0xe27   :  { %v1546_v63 = vpop.permute.xlu0 %1545 }
 0xe28   :  { %v1559_v61 = vmul.f32 %v3081_v43, %v1546_v63 }
 0xe2a   :  { %v1574_v56 = vpack.c.bf16 %v1559_v61, %v1558_v11 }
 0xe2c   :  { %2546 = vmatmul.mubr.msk.bf16.vlgmr.msra.gmra.mrb[36].mxu0 %vm118_vm0, %v1574_v56 }
 0xe2d   :  { %v1548_v36 = vpop.permute.xlu1 %1547  ;;  %1628 = vmatprep.mubr.bf16.mxu0 %v3319_v0 }
 0xe2e   :  { %v1560_v18 = vmul.f32 %v3083_v13, %v1548_v36 }
 0xe2f   :  { %v1550_v33 = vpop.permute.xlu0 %1549 }
 0xe30   :  { %v1561_v7 = vmul.f32 %v3085_v15, %v1550_v33 }
 0xe32   :  { %v1575_v16 = vpack.c.bf16 %v1561_v7, %v1560_v18 }
 0xe34   :  { %2547 = vmatmul.mubr.msk.bf16.gmra.mrb[40].mxu0 %vm118_vm0, %v1575_v16 }
 0xe35   :  { %1638 = vmatprep.mubr.bf16.mxu0 %v3319_v0  ;;  %v1552_v24 = vpop.permute.xlu1 %1551 }
 0xe36   :  { %v1562_v29 = vmul.f32 %v3087_v44, %v1552_v24 }
 0xe38   :  { %v1576_v35 = vpack.c.bf16 %v1562_v29, %v1562_v29 }
 0xe3c   :  { %2548 = vmatmul.mubr.msk.bf16.gmra.mrb[44].mxu0 %vm118_vm0, %v1576_v35 }
 0xeff   :  { %v1620_v42 = vpop.f32.mrb[36].mxu0 }
 0xf00   :  { %v1622_v3 = vpop.f32.mrb[37].mxu0  ;;  %v1647_v30 = vadd.f32 %v1620_v42, %v1564_v20 }
 0xf01   :  { %v3847_v21 = vadd.f32 %v1622_v3, %v1565_v59  ;;  %v1624_v25 = vpop.f32.mrb[38].mxu0 }
 0xf02   :  { %v1626_v45 = vpop.f32.mrb[39].mxu0  ;;  %v2549_v60 = vmul.f32 -1.442695, %v1647_v30  ;;  %v1649_v14 = vadd.f32 %v1624_v25, %v1566_v53 }
 0xf03   :  { %3088 = vtanh.f32 %v3847_v21  ;;  %v3850_v46 = vadd.f32 %v1626_v45, %v1567_v28 }
 0xf04   :  { %v2551_v57 = vmul.f32 -1.442695, %v1649_v14 }
 0xf05   :  { %3090 = vtanh.f32 %v3850_v46 }
 0xf07   :  { %v1630_v48 = vpop.f32.mrb[40].mxu0 }
 0xf08   :  { %v1632_v37 = vpop.f32.mrb[41].mxu0  ;;  %v1651_v62 = vadd.f32 %v1630_v48, %v1568_v47 }
 0xf09   :  { %v3853_v40 = vadd.f32 %v1632_v37, %v1569_v38  ;;  %v1634_v17 = vpop.f32.mrb[42].mxu0 }
 0xf0a   :  { %v1636_v19 = vpop.f32.mrb[43].mxu0  ;;  %v2553_v9 = vmul.f32 -1.442695, %v1651_v62  ;;  %v1653_v51 = vadd.f32 %v1634_v17, %v1570_v32 }
 0xf0b   :  { %3092 = vtanh.f32 %v3853_v40  ;;  %v3856_v39 = vadd.f32 %v1636_v19, %v1571_v4  ;;  %v2554_v14 = vmul.f32 -1.442695, %v3853_v40 }
 0xf0c   :  { %v2555_v22 = vmul.f32 -1.442695, %v1653_v51 }
 0xf0d   :  { %v3089_v31 = vpop.eup %3088  ;;  %3094 = vtanh.f32 %v3856_v39  ;;  %v2556_v47 = vmul.f32 -1.442695, %v3856_v39 }
 0xf0e   :  { %1732 = vrot.lane.b32.xlu0 %v3089_v31, %s3317_s0 }
 0xf0f   :  { %v1640_v6 = vpop.f32.mrb[44].mxu0  ;;  %v3091_v23 = vpop.eup %3090 }
 0xf10   :  { %v1642_v41 = vpop.f32.mrb[45].mxu0  ;;  %1734 = vrot.lane.b32.xlu1 %v3091_v23, %s3317_s0  ;;  %v1655_v43 = vadd.f32 %v1640_v6, %v1572_v52 }
 0xf11   :  { %v1644_v34 = vpop.f32.mrb[46].mxu0  ;;  %v3861_v12 = vadd.f32 %v1642_v41, %v1573_v8 }
 0xf12   :  { %v1645_v1 = vpop.f32.mrb[47].mxu0  ;;  %v2557_v11 = vmul.f32 -1.442695, %v1655_v43 }
 0xf13   :  { %3096 = vtanh.f32 %v3861_v12  ;;  %v2558_v32 = vmul.f32 -1.442695, %v3861_v12 }
 0xf14   :  { %3098 = vpow2.f32 %v2549_v60  ;;  %v2550_v60 = vmul.f32 -1.442695, %v3847_v21 }
 0xf15   :  { %v3093_v54 = vpop.eup %3092  ;;  %3100 = vpow2.f32 %v2551_v57 }
 0xf16   :  { %1736 = vrot.lane.b32.xlu0 %v3093_v54, %s3317_s0  ;;  %3102 = vpow2.f32 %v2553_v9 }
 0xf17   :  { %v3095_v27 = vpop.eup %3094  ;;  %3104 = vpow2.f32 %v2555_v22 }
 0xf18   :  { %1738 = vrot.lane.b32.xlu1 %v3095_v27, %s3317_s0 }
 0xf1d   :  { %v3097_v49 = vpop.eup %3096 }
 0xf1e   :  { %1740 = vrot.lane.b32.xlu0 %v3097_v49, %s3317_s0  ;;  %v3099_v55 = vpop.eup %3098 }
 0xf1f   :  { %v1687_v63 = vadd.f32 1.0, %v3099_v55  ;;  %v3101_v10 = vpop.eup %3100 }
 0xf20   :  { %v3103_v61 = vpop.eup %3102  ;;  %v1689_v56 = vadd.f32 1.0, %v3101_v10 }
 0xf21   :  { %3106 = vrcp.f32 %v1687_v63  ;;  %v1691_v36 = vadd.f32 1.0, %v3103_v61  ;;  %v3105_v13 = vpop.eup %3104 }
 0xf22   :  { %3108 = vpow2.f32 %v2557_v11  ;;  %v1693_v15 = vadd.f32 1.0, %v3105_v13 }
 0xf23   :  { %3110 = vrcp.f32 %v1689_v56 }
 0xf24   :  { %3112 = vrcp.f32 %v1691_v36 }
 0xf25   :  { %3114 = vrcp.f32 %v1693_v15 }
 0xf2b   :  { %v3107_v33 = vpop.eup %3106 }
 0xf2c   :  { %v3109_v16 = vpop.eup %3108  ;;  %v1722_v17 = vmul.f32 %v3107_v33, %v3813_v2 }
 0xf2d   :  { %v3111_v44 = vpop.eup %3110  ;;  %v1695_v29 = vadd.f32 1.0, %v3109_v16 }
 0xf2e   :  { %v3113_v59 = vpop.eup %3112  ;;  %v1723_v31 = vmul.f32 %v3111_v44, %v3817_v5 }
 0xf2f   :  { %3116 = vrcp.f32 %v1695_v29  ;;  %v3115_v25 = vpop.eup %3114  ;;  %v1724_v41 = vmul.f32 %v3113_v59, %v3821_v58 }
 0xf30   :  { %v1725_v2 = vmul.f32 %v3115_v25, %v3825_v50 }
 0xf39   :  { %v3117_v38 = vpop.eup %3116 }
 0xf3a   :  { %v1726_v58 = vmul.f32 %v3117_v38, %v3831_v26  ;;  %v2552_v26 = vmul.f32 -1.442695, %v3850_v46 }
 0xf80   :  { %v1733_v18 = vpop.permute.xlu0 %1732 }
 0xf81   :  { %v1747_v7 = vmul.f32 %v3107_v33, %v1733_v18 }
 0xf82   :  { %v1735_v24 = vpop.permute.xlu1 %1734 }
 0xf83   :  { %1757 = vrot.lane.b32.xlu1 %v1747_v7, %s3317_s0  ;;  %v1748_v35 = vmul.f32 %v3111_v44, %v1735_v24 }
 0xf85   :  { %1759 = vrot.lane.b32.xlu0 %v1748_v35, %s3317_s0  ;;  %v1809_v35 = vld [vmem:[#allocation2 + $0x238] sm:$0xff] }
 0xf88   :  { %v1737_v42 = vpop.permute.xlu0 %1736 }
 0xf89   :  { %v1749_v3 = vmul.f32 %v3113_v59, %v1737_v42 }
 0xf8a   :  { %v1739_v28 = vpop.permute.xlu1 %1738 }
 0xf8b   :  { %1761 = vrot.lane.b32.xlu1 %v1749_v3, %s3317_s0  ;;  %v1750_v45 = vmul.f32 %v3115_v25, %v1739_v28  ;;  %v1811_v28 = vld [vmem:[#allocation2 + $0x248] sm:$0xff] }
 0xf8d   :  { %1763 = vrot.lane.b32.xlu0 %v1750_v45, %s3317_s0 }
 0xf90   :  { %v1741_v48 = vpop.permute.xlu0 %1740 }
 0xf91   :  { %v1751_v37 = vmul.f32 %v3117_v38, %v1741_v48  ;;  %v1813_v48 = vld [vmem:[#allocation2 + $0x258] sm:$0xff] }
 0xf93   :  { %1765 = vrot.lane.b32.xlu1 %v1751_v37, %s3317_s0 }
 0xff5   :  { %v1758_v4 = vpop.permute.xlu1 %1757 }
 0xff6   :  { %v3873_v19 = vadd.f32 %v1758_v4, %v1722_v17 }
 0xff7   :  { %v1760_v6 = vpop.permute.xlu0 %1759 }
 0xff8   :  { %3118 = vtanh.f32 %v3873_v19  ;;  %v3877_v8 = vadd.f32 %v1760_v6, %v1723_v31  ;;  %v1815_v31 = vld [vmem:[#allocation2 + $0x268] sm:$0xff] }
 0xffa   :  { %3120 = vtanh.f32 %v3877_v8 }
 0xffd   :  { %v1762_v34 = vpop.permute.xlu1 %1761 }
 0xffe   :  { %v3881_v23 = vadd.f32 %v1762_v34, %v1724_v41 }
 0xfff   :  { %v1764_v54 = vpop.permute.xlu0 %1763 }
0x1000   :  { %3122 = vtanh.f32 %v3881_v23  ;;  %v3885_v27 = vadd.f32 %v1764_v54, %v1725_v2 }
0x1002   :  { %v3119_v1 = vpop.eup %3118  ;;  %3124 = vtanh.f32 %v3885_v27 }
0x1003   :  { %1787 = vrot.lane.b32.xlu0 %v3119_v1, %s3317_s0  ;;  %v1817_v1 = vld [vmem:[#allocation2 + $0x278] sm:$0xff] }
0x1004   :  { %v3121_v5 = vpop.eup %3120 }
0x1005   :  { %1789 = vrot.lane.b32.xlu1 %v3121_v5, %s3317_s0  ;;  %v1766_v49 = vpop.permute.xlu1 %1765 }
0x1006   :  { %v3891_v30 = vadd.f32 %v1766_v49, %v1726_v58 }
0x1008   :  { %3126 = vtanh.f32 %v3891_v30 }
0x1009   :  { %3128 = vpow2.f32 %v2550_v60 }
0x100a   :  { %v3123_v20 = vpop.eup %3122  ;;  %3130 = vpow2.f32 %v2552_v26  ;;  %v1808_v26 = vld [vmem:[#allocation2 + $0x230] sm:$0xff] }
0x100b   :  { %1791 = vrot.lane.b32.xlu0 %v3123_v20, %s3317_s0  ;;  %3132 = vpow2.f32 %v2554_v14 }
0x100c   :  { %v3125_v50 = vpop.eup %3124  ;;  %3134 = vpow2.f32 %v2556_v47  ;;  %v1810_v47 = vld [vmem:[#allocation2 + $0x240] sm:$0xff] }
0x100d   :  { %1793 = vrot.lane.b32.xlu1 %v3125_v50, %s3317_s0  ;;  %3136 = vpow2.f32 %v2558_v32  ;;  %v1812_v32 = vld [vmem:[#allocation2 + $0x250] sm:$0xff] }
0x1012   :  { %v3127_v53 = vpop.eup %3126 }
0x1013   :  { %1795 = vrot.lane.b32.xlu0 %v3127_v53, %s3317_s0  ;;  %v3129_v62 = vpop.eup %3128 }
0x1014   :  { %v3131_v57 = vpop.eup %3130  ;;  %v1688_v9 = vadd.f32 1.0, %v3129_v62 }
0x1015   :  { %v1690_v51 = vadd.f32 1.0, %v3131_v57  ;;  %v3133_v22 = vpop.eup %3132 }
0x1016   :  { %3138 = vrcp.f32 %v1688_v9  ;;  %v3135_v21 = vpop.eup %3134  ;;  %v1692_v46 = vadd.f32 1.0, %v3133_v22  ;;  %v1814_v22 = vld [vmem:[#allocation2 + $0x260] sm:$0xff] }
0x1017   :  { %3140 = vrcp.f32 %v1690_v51  ;;  %v1694_v52 = vadd.f32 1.0, %v3135_v21  ;;  %v3137_v55 = vpop.eup %3136 }
0x1018   :  { %3142 = vrcp.f32 %v1692_v46  ;;  %v1696_v10 = vadd.f32 1.0, %v3137_v55  ;;  %v1816_v55 = vld [vmem:[#allocation2 + $0x270] sm:$0xff] }
0x1019   :  { %3144 = vrcp.f32 %v1694_v52 }
0x101a   :  { %3146 = vrcp.f32 %v1696_v10 }
0x1020   :  { %v3139_v39 = vpop.eup %3138 }
0x1021   :  { %v3141_v43 = vpop.eup %3140 }
0x1022   :  { %v3143_v36 = vpop.eup %3142 }
0x1023   :  { %v3145_v13 = vpop.eup %3144 }
0x1024   :  { %v3147_v16 = vpop.eup %3146 }
0x1075   :  { %v1788_v40 = vpop.permute.xlu0 %1787 }
0x1076   :  { %v1802_v11 = vmul.f32 %v3139_v39, %v1788_v40 }
0x1077   :  { %v1790_v63 = vpop.permute.xlu1 %1789 }
0x1078   :  { %v1803_v61 = vmul.f32 %v3141_v43, %v1790_v63 }
0x107a   :  { %v1818_v12 = vpack.c.bf16 %v1803_v61, %v1802_v11 }
0x107c   :  { %2559 = vmatmul.mubr.msk.bf16.vlgmr.msra.gmra.mrb[36].mxu1 %vm118_vm0, %v1818_v12 }
0x107d   :  { %v1792_v56 = vpop.permute.xlu0 %1791  ;;  %1872 = vmatprep.mubr.bf16.mxu1 %v3319_v0 }
0x107e   :  { %v1804_v33 = vmul.f32 %v3143_v36, %v1792_v56 }
0x107f   :  { %v1794_v15 = vpop.permute.xlu1 %1793 }
0x1080   :  { %v1805_v18 = vmul.f32 %v3145_v13, %v1794_v15 }
0x1082   :  { %v1819_v7 = vpack.c.bf16 %v1805_v18, %v1804_v33 }
0x1084   :  { %2560 = vmatmul.mubr.msk.bf16.gmra.mrb[40].mxu1 %vm118_vm0, %v1819_v7 }
0x1085   :  { %1882 = vmatprep.mubr.bf16.mxu1 %v3319_v0  ;;  %v1796_v44 = vpop.permute.xlu0 %1795 }
0x1086   :  { %v1806_v24 = vmul.f32 %v3147_v16, %v1796_v44 }
0x1088   :  { %v1820_v29 = vpack.c.bf16 %v1806_v24, %v1806_v24 }
0x108c   :  { %2561 = vmatmul.mubr.msk.bf16.gmra.mrb[44].mxu1 %vm118_vm0, %v1820_v29 }
0x114f   :  { %v1864_v59 = vpop.f32.mrb[36].mxu1 }
0x1150   :  { %v1866_v42 = vpop.f32.mrb[37].mxu1  ;;  %v1891_v14 = vadd.f32 %v1864_v59, %v1808_v26 }
0x1151   :  { %v3907_v3 = vadd.f32 %v1866_v42, %v1809_v35  ;;  %v1868_v25 = vpop.f32.mrb[38].mxu1 }
0x1152   :  { %v1870_v45 = vpop.f32.mrb[39].mxu1  ;;  %v2562_v62 = vmul.f32 -1.442695, %v1891_v14  ;;  %v1893_v57 = vadd.f32 %v1868_v25, %v1810_v47 }
0x1153   :  { %3148 = vtanh.f32 %v3907_v3  ;;  %v3910_v38 = vadd.f32 %v1870_v45, %v1811_v28 }
0x1154   :  { %v2564_v9 = vmul.f32 -1.442695, %v1893_v57 }
0x1155   :  { %3150 = vtanh.f32 %v3910_v38 }
0x1157   :  { %v1874_v0 = vpop.f32.mrb[40].mxu1 }
0x1158   :  { %v1876_v37 = vpop.f32.mrb[41].mxu1  ;;  %v1895_v51 = vadd.f32 %v1874_v0, %v1812_v32 }
0x1159   :  { %v3913_v17 = vadd.f32 %v1876_v37, %v1813_v48  ;;  %v1878_v4 = vpop.f32.mrb[42].mxu1  ;;  %v2708_v37 = vld [vmem:[#allocation7 + $0x20] sm:$0xff]  }
0x115a   :  { %v1880_v6 = vpop.f32.mrb[43].mxu1  ;;  %v2566_v21 = vmul.f32 -1.442695, %v1895_v51  ;;  %v1897_v46 = vadd.f32 %v1878_v4, %v1814_v22  ;;  %v2710_v4 = vld [vmem:[#allocation7] sm:$0xff]  }
0x115b   :  { %3152 = vtanh.f32 %v3913_v17  ;;  %v3916_v41 = vadd.f32 %v1880_v6, %v1815_v31  ;;  %v3320_v31 = vmov 0.0   ;;  %v2709_v6 = vld [vmem:[#allocation7 + $0x28] sm:$0xff]  }
0x115c   :  { %v2568_v52 = vmul.f32 -1.442695, %v1897_v46  ;;  %2623 = vmatprep.subr.bf16.mxu0 %v3320_v31  ;;  %2635 = vmatprep.subr.bf16.mxu1 %v3320_v31 }
0x115d   :  { %v3149_v34 = vpop.eup %3148  ;;  %3154 = vtanh.f32 %v3916_v41  ;;  %2624 = vmatpush3.bf16.msra.mxu0 %v2708_v37  ;;  %2636 = vmatpush3.bf16.msra.mxu1 %v2710_v4  ;;  %v2723_v37 = vld [vmem:[#allocation7 + $0x58] sm:$0xff]  }
0x115e   :  { %1976 = vrot.lane.b32.xlu0 %v3149_v34, %s3317_s0  ;;  %v2711_v34 = vld [vmem:[#allocation7 + $0x8] sm:$0xff]   ;;  %2625 = vmatprep.subr.bf16.mxu0 %v3320_v31 }
0x115f   :  { %v1884_v2 = vpop.f32.mrb[44].mxu1  ;;  %v3151_v58 = vpop.eup %3150  ;;  %2637 = vmatprep.subr.bf16.mxu1 %v3320_v31  ;;  %2643 = vmatprep.mubr.msk.bf16.mxu1 %vm3321_vm1, %v3320_v31 }
0x1160   :  { %v1886_v54 = vpop.f32.mrb[45].mxu1  ;;  %1978 = vrot.lane.b32.xlu1 %v3151_v58, %s3317_s0  ;;  %v1899_v39 = vadd.f32 %v1884_v2, %v1816_v55  ;;  %v2712_v2 = vld [vmem:[#allocation7 + $0x30] sm:$0xff]   ;;  %2631 = vmatprep.mubr.msk.bf16.mxu0 %vm3321_vm1, %v3320_v31  ;;  %v2565_v55 = vmul.f32 -1.442695, %v3910_v38  ;;  %v2716_v38 = vld [vmem:[#allocation7 + $0x60] sm:$0xff]  }
0x1161   :  { %v1888_v5 = vpop.f32.mrb[46].mxu1  ;;  %v3921_v20 = vadd.f32 %v1886_v54, %v1817_v1  ;;  %2626 = vmatpush3.bf16.msra.mxu0 %v2709_v6  ;;  %2638 = vmatpush3.bf16.msra.mxu1 %v2711_v34  ;;  %v2713_v1 = vld [vmem:[#allocation7 + $0x10] sm:$0xff]   ;;  %v2724_v34 = vld [vmem:[#allocation7 + $0x80] sm:$0xff]  }
0x1162   :  { %v1889_v49 = vpop.f32.mrb[47].mxu1  ;;  %v2570_v10 = vmul.f32 -1.442695, %v1899_v39  ;;  %2627 = vmatprep.subr.bf16.mxu0 %v3320_v31  ;;  %2639 = vmatprep.subr.bf16.mxu1 %v3320_v31 }
0x1163   :  { %3156 = vtanh.f32 %v3921_v20  ;;  %v2714_v49 = vld [vmem:[#allocation7 + $0x38] sm:$0xff]  }
0x1164   :  { %3158 = vpow2.f32 %v2562_v62 }
0x1165   :  { %v3153_v50 = vpop.eup %3152  ;;  %3160 = vpow2.f32 %v2564_v9  ;;  %2628 = vmatpush3.bf16.msra.mxu0 %v2712_v2  ;;  %2640 = vmatpush3.bf16.msra.mxu1 %v2713_v1  ;;  %v2725_v1 = vld [vmem:[#allocation7 + $0x88] sm:$0xff]  }
0x1166   :  { %1980 = vrot.lane.b32.xlu1 %v3153_v50, %s3317_s0  ;;  %3162 = vpow2.f32 %v2566_v21  ;;  %2629 = vmatprep.subr.bf16.mxu0 %v3320_v31  ;;  %v2715_v50 = vld [vmem:[#allocation7 + $0x18] sm:$0xff]  }
0x1167   :  { %v3155_v53 = vpop.eup %3154  ;;  %3164 = vpow2.f32 %v2568_v52  ;;  %2641 = vmatprep.subr.bf16.mxu1 %v3320_v31  ;;  %v2563_v52 = vmul.f32 -1.442695, %v3907_v3 }
0x1168   :  { %1982 = vrot.lane.b32.xlu0 %v3155_v53, %s3317_s0 }
0x1169   :  { %2630 = vmatpush3.bf16.msra.mxu0 %v2714_v49  ;;  %2642 = vmatpush3.bf16.msra.mxu1 %v2715_v50  ;;  %v2727_v49 = vld [vmem:[#allocation7 + $0x98] sm:$0xff]  }
0x116a   :  { %2659 = vmatprep.subr.bf16.mxu1 %v3320_v31  ;;  %2647 = vmatprep.subr.bf16.mxu0 %v3320_v31 }
0x116d   :  { %v3157_v60 = vpop.eup %3156 }
0x116e   :  { %1984 = vrot.lane.b32.xlu1 %v3157_v60, %s3317_s0  ;;  %v3159_v40 = vpop.eup %3158 }
0x116f   :  { %v1931_v43 = vadd.f32 1.0, %v3159_v40  ;;  %v3161_v63 = vpop.eup %3160 }
0x1170   :  { %v1933_v11 = vadd.f32 1.0, %v3161_v63  ;;  %v3163_v61 = vpop.eup %3162  ;;  %v2567_v63 = vmul.f32 -1.442695, %v3913_v17 }
0x1171   :  { %3166 = vrcp.f32 %v1931_v43  ;;  %v1935_v12 = vadd.f32 1.0, %v3163_v61  ;;  %v3165_v56 = vpop.eup %3164 }
0x1172   :  { %3168 = vpow2.f32 %v2570_v10  ;;  %v1937_v36 = vadd.f32 1.0, %v3165_v56 }
0x1173   :  { %3170 = vrcp.f32 %v1933_v11 }
0x1174   :  { %3172 = vrcp.f32 %v1935_v12 }
0x1175   :  { %3174 = vrcp.f32 %v1937_v36 }
0x117b   :  { %v3167_v13 = vpop.eup %3166 }
0x117c   :  { %v3169_v18 = vpop.eup %3168  ;;  %v1966_v54 = vmul.f32 %v3167_v13, %v3873_v19 }
0x117d   :  { %v3171_v7 = vpop.eup %3170  ;;  %v1939_v44 = vadd.f32 1.0, %v3169_v18 }
0x117e   :  { %v3173_v29 = vpop.eup %3172  ;;  %v1967_v53 = vmul.f32 %v3171_v7, %v3877_v8 }
0x117f   :  { %3176 = vrcp.f32 %v1939_v44  ;;  %v3175_v42 = vpop.eup %3174  ;;  %v1968_v14 = vmul.f32 %v3173_v29, %v3881_v23 }
0x1180   :  { %v1969_v47 = vmul.f32 %v3175_v42, %v3885_v27 }
0x1189   :  { %v3177_v45 = vpop.eup %3176 }
0x118a   :  { %v1970_v23 = vmul.f32 %v3177_v45, %v3891_v30  ;;  %v2569_v30 = vmul.f32 -1.442695, %v3916_v41  ;;  %v2571_v41 = vmul.f32 -1.442695, %v3921_v20  ;;  %v2720_v20 = vld [vmem:[#allocation7 + $0x70] sm:$0xff]  }
0x11d0   :  { %v1977_v15 = vpop.permute.xlu0 %1976 }
0x11d1   :  { %v1991_v33 = vmul.f32 %v3167_v13, %v1977_v15 }
0x11d2   :  { %v1979_v16 = vpop.permute.xlu1 %1978 }
0x11d3   :  { %2001 = vrot.lane.b32.xlu1 %v1991_v33, %s3317_s0  ;;  %v1992_v24 = vmul.f32 %v3171_v7, %v1979_v16  ;;  %v2718_v7 = vld [vmem:[#allocation7 + $0x68] sm:$0xff]   ;;  %v2717_v16 = vld [vmem:[#allocation7 + $0x40] sm:$0xff]  }
0x11d5   :  { %2003 = vrot.lane.b32.xlu0 %v1992_v24, %s3317_s0  ;;  %v2719_v24 = vld [vmem:[#allocation7 + $0x48] sm:$0xff]  }
0x11d8   :  { %v1981_v35 = vpop.permute.xlu1 %1980 }
0x11d9   :  { %v1993_v59 = vmul.f32 %v3173_v29, %v1981_v35 }
0x11da   :  { %v1983_v25 = vpop.permute.xlu0 %1982 }
0x11db   :  { %2005 = vrot.lane.b32.xlu0 %v1993_v59, %s3317_s0  ;;  %v1994_v28 = vmul.f32 %v3175_v42, %v1983_v25  ;;  %v2722_v59 = vld [vmem:[#allocation7 + $0x78] sm:$0xff]   ;;  %v2721_v25 = vld [vmem:[#allocation7 + $0x50] sm:$0xff]  }
0x11dd   :  { %2007 = vrot.lane.b32.xlu1 %v1994_v28, %s3317_s0 }
0x11e0   :  { %v1985_v48 = vpop.permute.xlu1 %1984 }
0x11e1   :  { %v1995_v0 = vmul.f32 %v3177_v45, %v1985_v48 }
0x11e3   :  { %2009 = vrot.lane.b32.xlu0 %v1995_v0, %s3317_s0 }
0x1245   :  { %v2002_v5 = vpop.permute.xlu1 %2001 }
0x1246   :  { %v2016_v58 = vadd.f32 %v2002_v5, %v1966_v54  ;;  %v2726_v54 = vld [vmem:[#allocation7 + $0x90] sm:$0xff]  }
0x1247   :  { %v2004_v60 = vpop.permute.xlu0 %2003 }
0x1248   :  { %3178 = vtanh.f32 %v2016_v58  ;;  %v2017_v26 = vadd.f32 %v2004_v60, %v1967_v53 }
0x124a   :  { %3180 = vtanh.f32 %v2017_v26 }
0x124d   :  { %v2006_v19 = vpop.permute.xlu0 %2005 }
0x124e   :  { %v2018_v8 = vadd.f32 %v2006_v19, %v1968_v14 }
0x124f   :  { %v2008_v57 = vpop.permute.xlu1 %2007 }
0x1250   :  { %3182 = vtanh.f32 %v2018_v8  ;;  %v2019_v32 = vadd.f32 %v2008_v57, %v1969_v47 }
0x1252   :  { %v3179_v62 = vpop.eup %3178  ;;  %3184 = vtanh.f32 %v2019_v32 }
0x1253   :  { %2031 = vrot.lane.b32.xlu0 %v3179_v62, %s3317_s0 }
0x1254   :  { %v3181_v9 = vpop.eup %3180 }
0x1255   :  { %2033 = vrot.lane.b32.xlu1 %v3181_v9, %s3317_s0  ;;  %v2010_v51 = vpop.permute.xlu0 %2009 }
0x1256   :  { %v2020_v22 = vadd.f32 %v2010_v51, %v1970_v23 }
0x1258   :  { %3186 = vtanh.f32 %v2020_v22 }
0x1259   :  { %3188 = vpow2.f32 %v2563_v52 }
0x125a   :  { %v3183_v21 = vpop.eup %3182  ;;  %3190 = vpow2.f32 %v2565_v55 }
0x125b   :  { %2035 = vrot.lane.b32.xlu1 %v3183_v21, %s3317_s0  ;;  %3192 = vpow2.f32 %v2569_v30  ;;  %v2597_v30 = vld [vmem:[%s4001_s3] ss:$0 sm:$0xff] }
0x125c   :  { %v3185_v46 = vpop.eup %3184 }
0x125d   :  { %2037 = vrot.lane.b32.xlu0 %v3185_v46, %s3317_s0 }
0x1262   :  { %v3187_v27 = vpop.eup %3186 }
0x1263   :  { %2039 = vrot.lane.b32.xlu1 %v3187_v27, %s3317_s0  ;;  %v3189_v40 = vpop.eup %3188 }
0x1264   :  { %v1932_v39 = vadd.f32 1.0, %v3189_v40  ;;  %v3191_v43 = vpop.eup %3190 }
0x1265   :  { %v1934_v10 = vadd.f32 1.0, %v3191_v43  ;;  %v3193_v11 = vpop.eup %3192 }
0x1266   :  { %3194 = vrcp.f32 %v1932_v39  ;;  %v1938_v12 = vadd.f32 1.0, %v3193_v11 }
0x1267   :  { %3196 = vpow2.f32 %v2567_v63 }
0x1268   :  { %3198 = vrcp.f32 %v1934_v10 }
0x1269   :  { %3200 = vrcp.f32 %v1938_v12 }
0x126a   :  { %3202 = vpow2.f32 %v2571_v41 }
0x1270   :  { %v3195_v61 = vpop.eup %3194 }
0x1271   :  { %v3197_v36 = vpop.eup %3196 }
0x1272   :  { %v3199_v15 = vpop.eup %3198  ;;  %v1936_v33 = vadd.f32 1.0, %v3197_v36 }
0x1273   :  { %v3201_v35 = vpop.eup %3200 }
0x1274   :  { %3204 = vrcp.f32 %v1936_v33  ;;  %v3203_v45 = vpop.eup %3202 }
0x1275   :  { %v1940_v6 = vadd.f32 1.0, %v3203_v45 }
0x1277   :  { %3206 = vrcp.f32 %v1940_v6 }
0x127e   :  { %v3205_v48 = vpop.eup %3204 }
0x1281   :  { %v3207_v58 = vpop.eup %3206 }
0x12c5   :  { %v2032_v3 = vpop.permute.xlu0 %2031 }
0x12c6   :  { %v2046_v56 = vmul.f32 %v3195_v61, %v2032_v3 }
0x12c7   :  { %v2034_v18 = vpop.permute.xlu1 %2033 }
0x12c8   :  { %v2051_v13 = vpack.c.bf16 %v2046_v56, %v2046_v56  ;;  %v2047_v17 = vmul.f32 %v3199_v15, %v2034_v18 }
0x12ca   :  { %2644 = vmatmul.mubr.msk.bf16.vlgmr.msra.gmra.mrb[48].mxu1 %vm118_vm0, %v2051_v13  ;;  %v2060_v44 = vpack.c.bf16 %v2047_v17, %v2047_v17 }
0x12cb   :  { %2660 = vmatpush3.bf16.msra.mxu1 %v2716_v38  ;;  %2667 = vmatprep.mubr.msk.bf16.mxu1 %vm3321_vm1, %v3320_v31 }
0x12cc   :  { %2661 = vmatprep.subr.bf16.mxu1 %v3320_v31  ;;  %2632 = vmatmul.mubr.msk.bf16.vlgmr.msra.gmra.mrb[48].mxu0 %vm118_vm0, %v2060_v44 }
0x12cd   :  { %2648 = vmatpush3.bf16.msra.mxu0 %v2717_v16  ;;  %2655 = vmatprep.mubr.msk.bf16.mxu0 %vm3321_vm1, %v3320_v31  ;;  %v2036_v28 = vpop.permute.xlu1 %2035 }
0x12ce   :  { %2649 = vmatprep.subr.bf16.mxu0 %v3320_v31  ;;  %v2048_v4 = vmul.f32 %v3205_v48, %v2036_v28 }
0x12cf   :  { %2662 = vmatpush3.bf16.msra.mxu1 %v2718_v7  ;;  %v2038_v29 = vpop.permute.xlu0 %2037 }
0x12d0   :  { %2663 = vmatprep.subr.bf16.mxu1 %v3320_v31  ;;  %v2049_v42 = vmul.f32 %v3201_v35, %v2038_v29  ;;  %v2204_v2 = vpack.c.bf16 %v2048_v4, %v2048_v4 }
0x12d1   :  { %2650 = vmatpush3.bf16.msra.mxu0 %v2719_v24 }
0x12d2   :  { %2651 = vmatprep.subr.bf16.mxu0 %v3320_v31  ;;  %v2282_v0 = vpack.c.bf16 %v2049_v42, %v2049_v42 }
0x12d3   :  { %2664 = vmatpush3.bf16.msra.mxu1 %v2720_v20 }
0x12d4   :  { %2665 = vmatprep.subr.bf16.mxu1 %v3320_v31 }
0x12d5   :  { %2652 = vmatpush3.bf16.msra.mxu0 %v2721_v25  ;;  %v2040_v5 = vpop.permute.xlu1 %2039 }
0x12d6   :  { %2653 = vmatprep.subr.bf16.mxu0 %v3320_v31  ;;  %v2050_v50 = vmul.f32 %v3207_v58, %v2040_v5 }
0x12d7   :  { %2666 = vmatpush3.bf16.msra.mxu1 %v2722_v59 }
0x12d8   :  { %v2360_v53 = vpack.c.bf16 %v2050_v50, %v2050_v50 }
0x12d9   :  { %2654 = vmatpush3.bf16.msra.mxu0 %v2723_v37 }
0x12da   :  { %2668 = vmatmul.mubr.msk.bf16.vlgmr.msra.gmra.mrb[52].mxu1 %vm118_vm0, %v2282_v0  ;;  %2671 = vmatprep.subr.bf16.mxu0 %v3320_v31 }
0x12dc   :  { %2656 = vmatmul.mubr.msk.bf16.vlgmr.msra.gmra.mrb[52].mxu0 %vm118_vm0, %v2204_v2 }
0x12dd   :  { %2672 = vmatpush3.bf16.msra.mxu0 %v2724_v34  ;;  %2679 = vmatprep.mubr.msk.bf16.mxu0 %vm3321_vm1, %v3320_v31 }
0x12de   :  { %2673 = vmatprep.subr.bf16.mxu0 %v3320_v31 }
0x12e1   :  { %2674 = vmatpush3.bf16.msra.mxu0 %v2725_v1 }
0x12e2   :  { %2675 = vmatprep.subr.bf16.mxu0 %v3320_v31 }
0x12e5   :  { %2676 = vmatpush3.bf16.msra.mxu0 %v2726_v54 }
0x12e6   :  { %2677 = vmatprep.subr.bf16.mxu0 %v3320_v31 }
0x12e9   :  { %2678 = vmatpush3.bf16.msra.mxu0 %v2727_v49 }
0x12ec   :  { %2680 = vmatmul.mubr.msk.bf16.vlgmr.msra.gmra.mrb[56].mxu0 %vm118_vm0, %v2360_v53 }
0x139d   :  { %v2198_v60 = vpop.f32.mrb[48].mxu1 }
0x139e   :  { %v2645_v26 = vpop.f32.mrb[49].mxu1 }
0x139f   :  { %v2201_v14 = vpop.f32.mrb[50].mxu1  ;;  %v2131_v8 = vpop.f32.mrb[48].mxu0 }
0x13a0   :  { %v2646_v19 = vpop.f32.mrb[51].mxu1  ;;  %v2199_v47 = vadd.f32 %v2198_v60, %v2131_v8  ;;  %v2633_v62 = vpop.f32.mrb[49].mxu0 }
0x13a1   :  { %v2134_v57 = vpop.f32.mrb[50].mxu0 }
0x13a2   :  { %v2634_v32 = vpop.f32.mrb[51].mxu0 }
0x13ad   :  { %v2353_v9 = vpop.f32.mrb[52].mxu1 }
0x13ae   :  { %v2669_v23 = vpop.f32.mrb[53].mxu1 }
0x13af   :  { %v2356_v51 = vpop.f32.mrb[54].mxu1  ;;  %v2275_v21 = vpop.f32.mrb[52].mxu0 }
0x13b0   :  { %v2670_v22 = vpop.f32.mrb[55].mxu1  ;;  %v2281_v46 = vadd.f32 %v2275_v21, %v2199_v47  ;;  %v2657_v31 = vpop.f32.mrb[53].mxu0 }
0x13b1   :  { %v2278_v27 = vpop.f32.mrb[54].mxu0 }
0x13b2   :  { %v2658_v52 = vpop.f32.mrb[55].mxu0  ;;  %v2359_v55 = vadd.f32 %v2353_v9, %v2281_v46 }
0x13bf   :  { %v2431_v40 = vpop.f32.mrb[56].mxu0 }
0x13c0   :  { %v2437_v39 = vadd.f32 %v2431_v40, %v2359_v55  ;;  %v2681_v43 = vpop.f32.mrb[57].mxu0 }
0x13c1   :  { %v2434_v63 = vpop.f32.mrb[58].mxu0 }
0x13c2   :  { %v2445_v10 = vadd.f32 %v2597_v30, %v2437_v39  ;;  %v2682_v11 = vpop.f32.mrb[59].mxu0 }
0x13c4   :  { %2446 = vst.msk [vmem:[#allocation8] sm:$0xff] %vm118_vm0, %v2445_v10 }
0x13c5   :  { %3293 = shalt.err (!%p3290_p0)
}
0x13c6   :  { %s3294_s3 = scalar_lea.hbm %s4002_s4, 128 }
0x13c7   :  { %p3295_p1 = scmp.ne.s32.totalorder %s4002_s4, %s3294_s3  ;;  %p3298_p2 = scmp.lt.u32.totalorder %s3294_s3, %s4002_s4 }
0x13c9   :  { %p3300_p3 = pnand %p3298_p2, %p3295_p1 }
0x13cb   :  { %3303 = shalt.err (!%p3300_p3)
}
0x13cc   :  { %2456 = dma.vmem_to_hbm [thread:$0]  %s2454_s5, 128, %s4002_s4, [#allocation4]  }
0x13cd   :  { %3308 = dma.done.wait [#allocation4], 128  }
0x13ce   :  { %3309 = vsyncadd [#allocation4], 4294967168 }
0x13cf   :  { %2460 = vsyncpa [#allocation3], 1 }
0x13d0   :  { %2461 = vsyncpa [#allocation6], 1 }
0x13d1   :  { %2462 = vsyncpa [#allocation4], 1 }

</bundles_post_ra>
